<compile_context>
chip_gen: v7x
topology: tpu7x:2x2x1
jax: 0.10.0
libtpu: 0.0.40
codegen_flags: <defaults>
</compile_context>

<pallas_src>
import jax
import jax.numpy as jnp
from jax.experimental import pallas as pl
from jax.experimental.pallas import tpu as pltpu

B, T, D, H = 2, 18, 16, 32      # batch, seq (fixed at 18 by the module), input_size, hidden_size
NUM_LAYERS = 3
OUT = 2
NSTEPS = T + NUM_LAYERS - 1     # 20 wavefront steps


def ensemble_rnn_kernel(x_ref, wbd_ref, bf_ref, wbig_ref, b12_ref,
                        w2bd_ref, b2_ref, out_ref, h2_scr):
    # ---- Stage 1 (+ layer-0 input-to-hidden, folded at init): one off-chain dot ----
    # x (B, T*D) @ block-diag (T*D, T*H) -> pre0 (B, T*H); lane block t holds the
    # pre-activation of RNN layer 0 at time t (18 ensemble Linears + wih0 + biases folded).
    # NOTE: the structural zeros in the block-diag weight mean a non-finite value in one
    # timestep of x would propagate (0*Inf=NaN) to other time blocks, unlike the original
    # per-timestep Linears; fine for finite inputs.
    pre0 = (jnp.dot(x_ref[...], wbd_ref[...], preferred_element_type=jnp.float32)
            + bf_ref[...])                                        # (B, T*H)

    wbig = wbig_ref[...]                                          # (3H, 3H), hoisted
    b12b = jnp.broadcast_to(b12_ref[...], (B, 2 * H))             # (B, 2H), hoisted once
    adds_tail = jnp.concatenate(
        [jnp.zeros((B, H), jnp.float32), b12b], axis=1)           # for steps s >= T
    lane = jax.lax.broadcasted_iota(jnp.int32, (B, 3 * H), 1)

    # ---- Stage 2: wavefront over (layer, time) --------------------------------------
    # state after step s = [h0[s], h1[s-1], h2[s-2]]; one structured matmul per step
    # updates all three layers.  h_l[-1] = 0 handled by zero padding / one-time masking.
    # s = 0: only layer 0 active and its previous hidden is 0, so skip the dot entirely.
    state = jnp.concatenate([jnp.tanh(pre0[:, 0:H]),
                             jnp.zeros((B, 2 * H), jnp.float32)], axis=1)

    for s in range(1, NSTEPS):                                    # s = 1..19, fully unrolled
        z = jnp.dot(state, wbig, preferred_element_type=jnp.float32)   # (B, 3H), on chain
        if s < T:
            adds = jnp.concatenate([pre0[:, s * H:(s + 1) * H], b12b], axis=1)  # off chain
        else:
            adds = adds_tail          # layer 0 is past the sequence end; its block is unused
        h = jnp.tanh(z + adds)
        if s == 1:
            h = jnp.where(lane < 2 * H, h, 0.0)    # layer 2 not started yet -> h2[-1] = 0
        state = h
        t2 = s - 2                                  # layer-2 output time index
        if t2 >= 0:
            h2_scr[:, t2 * H:(t2 + 1) * H] = state[:, 2 * H:3 * H]   # vst slot, off chain

    # ---- Stage 3: fc2 as one lane-dense block-diagonal dot -> (B, T*OUT) -------------
    out_ref[...] = (jnp.dot(h2_scr[...], w2bd_ref[...], preferred_element_type=jnp.float32)
                    + b2_ref[...])


def pack_params(wp, bp, wih, whh, bih, bhh, w2, b2):
    """One-time, parameter-only packing (hoisted out of the per-call path)."""
    hp = jax.lax.Precision.HIGHEST
    # Fold the 18 ensemble Linears with the layer-0 input-to-hidden matmul.
    wfold = jnp.einsum('tdh,hk->tdk', wp, wih[0], precision=hp)          # (T, D, H)
    bfold = jnp.dot(bp, wih[0], precision=hp) + bih[0] + bhh[0]          # (T, H)
    wbd = jnp.zeros((T * D, T * H), jnp.float32)
    for t in range(T):
        wbd = wbd.at[t * D:(t + 1) * D, t * H:(t + 1) * H].set(wfold[t])
    bf = bfold.reshape(1, T * H)
    # Wavefront weight: lhs blocks [h0_prev, h1_prev, h2_prev] -> new [h0, h1, h2].
    wbig = jnp.zeros((3 * H, 3 * H), jnp.float32)
    wbig = wbig.at[0:H, 0:H].set(whh[0])
    wbig = wbig.at[0:H, H:2 * H].set(wih[1])
    wbig = wbig.at[H:2 * H, H:2 * H].set(whh[1])
    wbig = wbig.at[H:2 * H, 2 * H:3 * H].set(wih[2])
    wbig = wbig.at[2 * H:3 * H, 2 * H:3 * H].set(whh[2])
    b12 = jnp.concatenate([bih[1] + bhh[1], bih[2] + bhh[2]]).reshape(1, 2 * H)
    # Block-diagonal fc2 so the lane-dense (B, T*H) hidden maps to a lane-dense (B, T*OUT).
    w2bd = jnp.zeros((T * H, T * OUT), jnp.float32)
    for t in range(T):
        w2bd = w2bd.at[t * H:(t + 1) * H, t * OUT:(t + 1) * OUT].set(w2)
    b2row = jnp.tile(b2.reshape(1, OUT), (1, T))                         # (1, T*OUT)
    return wbd, bf, wbig, b12, w2bd, b2row


@jax.jit
def ensemble_rnn_forward(x, wbd, bf, wbig, b12, w2bd, b2row):
    x_flat = x.reshape(B, T * D)                 # free view: collapse (T, D) into lanes
    vmem = pl.BlockSpec(memory_space=pltpu.MemorySpace.VMEM)
    flops = (2 * B * (T * D) * (T * H)
             + (NSTEPS - 1) * 2 * B * (3 * H) * (3 * H)
             + 2 * B * (T * H) * (T * OUT))
    bytes_accessed = 4 * (B * T * D + T * D * T * H + T * H + 9 * H * H + 2 * H
                          + T * H * T * OUT + T * OUT + B * T * OUT)
    out = pl.pallas_call(
        ensemble_rnn_kernel,
        out_shape=jax.ShapeDtypeStruct((B, T * OUT), jnp.float32),
        in_specs=[vmem] * 7,
        out_specs=vmem,
        scratch_shapes=[pltpu.VMEM((B, T * H), jnp.float32)],
        cost_estimate=pl.CostEstimate(flops=flops,
                                      transcendentals=NSTEPS * B * 3 * H,
                                      bytes_accessed=bytes_accessed),
    )(x_flat, wbd, bf, wbig, b12, w2bd, b2row)
    return out.reshape(B, T, OUT)                # free view: (B, T*OUT) -> (B, T, OUT)


def reference_forward(x, wp, bp, wih, whh, bih, bhh, w2, b2):
    """Pure-JAX reference mirroring the PyTorch forward."""
    h = jnp.einsum('btd,tdh->bth', x, wp) + bp[None]
    for l in range(NUM_LAYERS):
        ht = jnp.zeros((B, H), jnp.float32)
        outs = []
        for t in range(T):
            ht = jnp.tanh(h[:, t, :] @ wih[l] + ht @ whh[l] + bih[l] + bhh[l])
            outs.append(ht)
        h = jnp.stack(outs, axis=1)
    return h @ w2 + b2


def init_params(key):
    """Deterministic init mimicking PyTorch's uniform(-1/sqrt(fan_in), 1/sqrt(fan_in))."""
    ks = jax.random.split(key, 9)
    u = lambda k, shape, fan_in: jax.random.uniform(
        k, shape, jnp.float32, -1.0 / jnp.sqrt(fan_in), 1.0 / jnp.sqrt(fan_in))
    wp = u(ks[0], (T, D, H), D)                 # 18 x Linear(D, H) weights, stored (in, out)
    bp = u(ks[1], (T, H), D)
    wih = u(ks[2], (NUM_LAYERS, H, H), H)       # RNN input-to-hidden, stored (in, out)
    whh = u(ks[3], (NUM_LAYERS, H, H), H)       # RNN hidden-to-hidden, stored (in, out)
    bih = u(ks[4], (NUM_LAYERS, H), H)
    bhh = u(ks[5], (NUM_LAYERS, H), H)
    w2 = u(ks[6], (H, OUT), H)                  # fc2 weight, stored (in, out)
    b2 = u(ks[7], (1, OUT), H)
    return wp, bp, wih, whh, bih, bhh, w2, b2


if __name__ == "__main__":
    key = jax.random.PRNGKey(0)
    kx, kp = jax.random.split(key)
    x = jax.random.normal(kx, (B, T, D), jnp.float32)
    params = init_params(kp)
    packed = pack_params(*params)               # once at init, not per call

    out = ensemble_rnn_forward(x, *packed)
    out = jax.block_until_ready(out)

    ref = reference_forward(x, *params)
    assert out.shape == (B, T, OUT)
    assert jnp.allclose(out, ref, atol=1e-4, rtol=1e-4), "kernel mismatch vs reference"
    print("KERNEL_OK")
</pallas_src>

<mosaic_0001>
module attributes {stable_mosaic.version = 11 : i64} {
  func.func @ensemble_rnn_kernel(%arg0: memref<2x288xf32, #tpu.memory_space<vmem>>, %arg1: memref<288x576xf32, #tpu.memory_space<vmem>>, %arg2: memref<1x576xf32, #tpu.memory_space<vmem>>, %arg3: memref<96x96xf32, #tpu.memory_space<vmem>>, %arg4: memref<1x64xf32, #tpu.memory_space<vmem>>, %arg5: memref<576x36xf32, #tpu.memory_space<vmem>>, %arg6: memref<1x36xf32, #tpu.memory_space<vmem>>, %arg7: memref<2x36xf32, #tpu.memory_space<vmem>>, %arg8: memref<2x576xf32, #tpu.memory_space<vmem>>) attributes {dimension_semantics = [], scalar_prefetch = 0 : i64, scratch_operands = 1 : i64, tpu.core_type = #tpu.core_type<tc>} {
    %c0 = arith.constant 0 : index
    %c0_0 = arith.constant 0 : index
    %0 = vector.load %arg0[%c0, %c0_0] : memref<2x288xf32, #tpu.memory_space<vmem>>, vector<2x288xf32>
    %c0_1 = arith.constant 0 : index
    %c0_2 = arith.constant 0 : index
    %1 = vector.load %arg1[%c0_1, %c0_2] : memref<288x576xf32, #tpu.memory_space<vmem>>, vector<288x576xf32>
    %cst = arith.constant dense<0.000000e+00> : vector<2x576xf32>
    %2 = tpu.matmul %0, %1, %cst {dimension_numbers = #tpu.dot_dimension_numbers<[1], [0], [0], [1], [0, 0, 1, 1], [], []>} : vector<2x288xf32>, vector<288x576xf32>, vector<2x576xf32> -> vector<2x576xf32>
    %c0_3 = arith.constant 0 : index
    %c0_4 = arith.constant 0 : index
    %3 = vector.load %arg2[%c0_3, %c0_4] : memref<1x576xf32, #tpu.memory_space<vmem>>, vector<1x576xf32>
    %4 = vector.broadcast %3 : vector<1x576xf32> to vector<2x576xf32>
    %5 = arith.addf %2, %4 : vector<2x576xf32>
    %c0_5 = arith.constant 0 : index
    %c0_6 = arith.constant 0 : index
    %6 = vector.load %arg3[%c0_5, %c0_6] : memref<96x96xf32, #tpu.memory_space<vmem>>, vector<96x96xf32>
    %c0_7 = arith.constant 0 : index
    %c0_8 = arith.constant 0 : index
    %7 = vector.load %arg4[%c0_7, %c0_8] : memref<1x64xf32, #tpu.memory_space<vmem>>, vector<1x64xf32>
    %8 = vector.shape_cast %7 : vector<1x64xf32> to vector<1x64xf32>
    %9 = vector.broadcast %8 : vector<1x64xf32> to vector<2x64xf32>
    %cst_9 = arith.constant 0.000000e+00 : f32
    %10 = vector.broadcast %cst_9 : f32 to vector<2x32xf32>
    %11 = tpu.concatenate %10, %9 in 1 : vector<2x32xf32>, vector<2x64xf32> -> vector<2x96xf32>
    %12 = tpu.iota {dimensions = array<i32: 1>} : vector<2x96xi32>
    %13 = vector.extract_strided_slice %5 {offsets = [0, 0], sizes = [2, 32], strides = [1, 1]} : vector<2x576xf32> to vector<2x32xf32>
    %14 = math.tanh %13 : vector<2x32xf32>
    %cst_10 = arith.constant 0.000000e+00 : f32
    %15 = vector.broadcast %cst_10 : f32 to vector<2x64xf32>
    %16 = tpu.concatenate %14, %15 in 1 : vector<2x32xf32>, vector<2x64xf32> -> vector<2x96xf32>
    %cst_11 = arith.constant dense<0.000000e+00> : vector<2x96xf32>
    %17 = tpu.matmul %16, %6, %cst_11 {dimension_numbers = #tpu.dot_dimension_numbers<[1], [0], [0], [1], [0, 0, 1, 1], [], []>} : vector<2x96xf32>, vector<96x96xf32>, vector<2x96xf32> -> vector<2x96xf32>
    %18 = vector.extract_strided_slice %5 {offsets = [0, 32], sizes = [2, 32], strides = [1, 1]} : vector<2x576xf32> to vector<2x32xf32>
    %19 = tpu.concatenate %18, %9 in 1 : vector<2x32xf32>, vector<2x64xf32> -> vector<2x96xf32>
    %20 = arith.addf %17, %19 : vector<2x96xf32>
    %21 = math.tanh %20 : vector<2x96xf32>
    %c64_i32 = arith.constant 64 : i32
    %22 = vector.broadcast %c64_i32 : i32 to vector<2x96xi32>
    %23 = arith.cmpi slt, %12, %22 : vector<2x96xi32>
    %cst_12 = arith.constant 0.000000e+00 : f32
    %24 = vector.broadcast %cst_12 : f32 to vector<2x96xf32>
    %25 = arith.select %23, %21, %24 : vector<2x96xi1>, vector<2x96xf32>
    %cst_13 = arith.constant dense<0.000000e+00> : vector<2x96xf32>
    %26 = tpu.matmul %25, %6, %cst_13 {dimension_numbers = #tpu.dot_dimension_numbers<[1], [0], [0], [1], [0, 0, 1, 1], [], []>} : vector<2x96xf32>, vector<96x96xf32>, vector<2x96xf32> -> vector<2x96xf32>
    %27 = vector.extract_strided_slice %5 {offsets = [0, 64], sizes = [2, 32], strides = [1, 1]} : vector<2x576xf32> to vector<2x32xf32>
    %28 = tpu.concatenate %27, %9 in 1 : vector<2x32xf32>, vector<2x64xf32> -> vector<2x96xf32>
    %29 = arith.addf %26, %28 : vector<2x96xf32>
    %30 = math.tanh %29 : vector<2x96xf32>
    %31 = vector.extract_strided_slice %30 {offsets = [0, 64], sizes = [2, 32], strides = [1, 1]} : vector<2x96xf32> to vector<2x32xf32>
    %c0_14 = arith.constant 0 : index
    %c0_15 = arith.constant 0 : index
    %32 = vector.load %arg8[%c0_14, %c0_15] : memref<2x576xf32, #tpu.memory_space<vmem>>, vector<2x32xf32>
    tpu.vector_store %arg8[%c0_14, %c0_15], %31 {strides = array<i32>} : memref<2x576xf32, #tpu.memory_space<vmem>>, vector<2x32xf32>,
    %cst_16 = arith.constant dense<0.000000e+00> : vector<2x96xf32>
    %33 = tpu.matmul %30, %6, %cst_16 {dimension_numbers = #tpu.dot_dimension_numbers<[1], [0], [0], [1], [0, 0, 1, 1], [], []>} : vector<2x96xf32>, vector<96x96xf32>, vector<2x96xf32> -> vector<2x96xf32>
    %34 = vector.extract_strided_slice %5 {offsets = [0, 96], sizes = [2, 32], strides = [1, 1]} : vector<2x576xf32> to vector<2x32xf32>
    %35 = tpu.concatenate %34, %9 in 1 : vector<2x32xf32>, vector<2x64xf32> -> vector<2x96xf32>
    %36 = arith.addf %33, %35 : vector<2x96xf32>
    %37 = math.tanh %36 : vector<2x96xf32>
    %38 = vector.extract_strided_slice %37 {offsets = [0, 64], sizes = [2, 32], strides = [1, 1]} : vector<2x96xf32> to vector<2x32xf32>
    %c0_17 = arith.constant 0 : index
    %c32 = arith.constant 32 : index
    %39 = vector.load %arg8[%c0_17, %c32] : memref<2x576xf32, #tpu.memory_space<vmem>>, vector<2x32xf32>
    tpu.vector_store %arg8[%c0_17, %c32], %38 {strides = array<i32>} : memref<2x576xf32, #tpu.memory_space<vmem>>, vector<2x32xf32>,
    %cst_18 = arith.constant dense<0.000000e+00> : vector<2x96xf32>
    %40 = tpu.matmul %37, %6, %cst_18 {dimension_numbers = #tpu.dot_dimension_numbers<[1], [0], [0], [1], [0, 0, 1, 1], [], []>} : vector<2x96xf32>, vector<96x96xf32>, vector<2x96xf32> -> vector<2x96xf32>
    %41 = vector.extract_strided_slice %5 {offsets = [0, 128], sizes = [2, 32], strides = [1, 1]} : vector<2x576xf32> to vector<2x32xf32>
    %42 = tpu.concatenate %41, %9 in 1 : vector<2x32xf32>, vector<2x64xf32> -> vector<2x96xf32>
    %43 = arith.addf %40, %42 : vector<2x96xf32>
    %44 = math.tanh %43 : vector<2x96xf32>
    %45 = vector.extract_strided_slice %44 {offsets = [0, 64], sizes = [2, 32], strides = [1, 1]} : vector<2x96xf32> to vector<2x32xf32>
    %c0_19 = arith.constant 0 : index
    %c64 = arith.constant 64 : index
    %46 = vector.load %arg8[%c0_19, %c64] : memref<2x576xf32, #tpu.memory_space<vmem>>, vector<2x32xf32>
    tpu.vector_store %arg8[%c0_19, %c64], %45 {strides = array<i32>} : memref<2x576xf32, #tpu.memory_space<vmem>>, vector<2x32xf32>,
    %cst_20 = arith.constant dense<0.000000e+00> : vector<2x96xf32>
    %47 = tpu.matmul %44, %6, %cst_20 {dimension_numbers = #tpu.dot_dimension_numbers<[1], [0], [0], [1], [0, 0, 1, 1], [], []>} : vector<2x96xf32>, vector<96x96xf32>, vector<2x96xf32> -> vector<2x96xf32>
    %48 = vector.extract_strided_slice %5 {offsets = [0, 160], sizes = [2, 32], strides = [1, 1]} : vector<2x576xf32> to vector<2x32xf32>
    %49 = tpu.concatenate %48, %9 in 1 : vector<2x32xf32>, vector<2x64xf32> -> vector<2x96xf32>
    %50 = arith.addf %47, %49 : vector<2x96xf32>
    %51 = math.tanh %50 : vector<2x96xf32>
    %52 = vector.extract_strided_slice %51 {offsets = [0, 64], sizes = [2, 32], strides = [1, 1]} : vector<2x96xf32> to vector<2x32xf32>
    %c0_21 = arith.constant 0 : index
    %c96 = arith.constant 96 : index
    %53 = vector.load %arg8[%c0_21, %c96] : memref<2x576xf32, #tpu.memory_space<vmem>>, vector<2x32xf32>
    tpu.vector_store %arg8[%c0_21, %c96], %52 {strides = array<i32>} : memref<2x576xf32, #tpu.memory_space<vmem>>, vector<2x32xf32>,
    %cst_22 = arith.constant dense<0.000000e+00> : vector<2x96xf32>
    %54 = tpu.matmul %51, %6, %cst_22 {dimension_numbers = #tpu.dot_dimension_numbers<[1], [0], [0], [1], [0, 0, 1, 1], [], []>} : vector<2x96xf32>, vector<96x96xf32>, vector<2x96xf32> -> vector<2x96xf32>
    %55 = vector.extract_strided_slice %5 {offsets = [0, 192], sizes = [2, 32], strides = [1, 1]} : vector<2x576xf32> to vector<2x32xf32>
    %56 = tpu.concatenate %55, %9 in 1 : vector<2x32xf32>, vector<2x64xf32> -> vector<2x96xf32>
    %57 = arith.addf %54, %56 : vector<2x96xf32>
    %58 = math.tanh %57 : vector<2x96xf32>
    %59 = vector.extract_strided_slice %58 {offsets = [0, 64], sizes = [2, 32], strides = [1, 1]} : vector<2x96xf32> to vector<2x32xf32>
    %c0_23 = arith.constant 0 : index
    %c128 = arith.constant 128 : index
    %60 = vector.load %arg8[%c0_23, %c128] : memref<2x576xf32, #tpu.memory_space<vmem>>, vector<2x32xf32>
    tpu.vector_store %arg8[%c0_23, %c128], %59 {strides = array<i32>} : memref<2x576xf32, #tpu.memory_space<vmem>>, vector<2x32xf32>,
    %cst_24 = arith.constant dense<0.000000e+00> : vector<2x96xf32>
    %61 = tpu.matmul %58, %6, %cst_24 {dimension_numbers = #tpu.dot_dimension_numbers<[1], [0], [0], [1], [0, 0, 1, 1], [], []>} : vector<2x96xf32>, vector<96x96xf32>, vector<2x96xf32> -> vector<2x96xf32>
    %62 = vector.extract_strided_slice %5 {offsets = [0, 224], sizes = [2, 32], strides = [1, 1]} : vector<2x576xf32> to vector<2x32xf32>
    %63 = tpu.concatenate %62, %9 in 1 : vector<2x32xf32>, vector<2x64xf32> -> vector<2x96xf32>
    %64 = arith.addf %61, %63 : vector<2x96xf32>
    %65 = math.tanh %64 : vector<2x96xf32>
    %66 = vector.extract_strided_slice %65 {offsets = [0, 64], sizes = [2, 32], strides = [1, 1]} : vector<2x96xf32> to vector<2x32xf32>
    %c0_25 = arith.constant 0 : index
    %c160 = arith.constant 160 : index
    %67 = vector.load %arg8[%c0_25, %c160] : memref<2x576xf32, #tpu.memory_space<vmem>>, vector<2x32xf32>
    tpu.vector_store %arg8[%c0_25, %c160], %66 {strides = array<i32>} : memref<2x576xf32, #tpu.memory_space<vmem>>, vector<2x32xf32>,
    %cst_26 = arith.constant dense<0.000000e+00> : vector<2x96xf32>
    %68 = tpu.matmul %65, %6, %cst_26 {dimension_numbers = #tpu.dot_dimension_numbers<[1], [0], [0], [1], [0, 0, 1, 1], [], []>} : vector<2x96xf32>, vector<96x96xf32>, vector<2x96xf32> -> vector<2x96xf32>
    %69 = vector.extract_strided_slice %5 {offsets = [0, 256], sizes = [2, 32], strides = [1, 1]} : vector<2x576xf32> to vector<2x32xf32>
    %70 = tpu.concatenate %69, %9 in 1 : vector<2x32xf32>, vector<2x64xf32> -> vector<2x96xf32>
    %71 = arith.addf %68, %70 : vector<2x96xf32>
    %72 = math.tanh %71 : vector<2x96xf32>
    %73 = vector.extract_strided_slice %72 {offsets = [0, 64], sizes = [2, 32], strides = [1, 1]} : vector<2x96xf32> to vector<2x32xf32>
    %c0_27 = arith.constant 0 : index
    %c192 = arith.constant 192 : index
    %74 = vector.load %arg8[%c0_27, %c192] : memref<2x576xf32, #tpu.memory_space<vmem>>, vector<2x32xf32>
    tpu.vector_store %arg8[%c0_27, %c192], %73 {strides = array<i32>} : memref<2x576xf32, #tpu.memory_space<vmem>>, vector<2x32xf32>,
    %cst_28 = arith.constant dense<0.000000e+00> : vector<2x96xf32>
    %75 = tpu.matmul %72, %6, %cst_28 {dimension_numbers = #tpu.dot_dimension_numbers<[1], [0], [0], [1], [0, 0, 1, 1], [], []>} : vector<2x96xf32>, vector<96x96xf32>, vector<2x96xf32> -> vector<2x96xf32>
    %76 = vector.extract_strided_slice %5 {offsets = [0, 288], sizes = [2, 32], strides = [1, 1]} : vector<2x576xf32> to vector<2x32xf32>
    %77 = tpu.concatenate %76, %9 in 1 : vector<2x32xf32>, vector<2x64xf32> -> vector<2x96xf32>
    %78 = arith.addf %75, %77 : vector<2x96xf32>
    %79 = math.tanh %78 : vector<2x96xf32>
    %80 = vector.extract_strided_slice %79 {offsets = [0, 64], sizes = [2, 32], strides = [1, 1]} : vector<2x96xf32> to vector<2x32xf32>
    %c0_29 = arith.constant 0 : index
    %c224 = arith.constant 224 : index
    %81 = vector.load %arg8[%c0_29, %c224] : memref<2x576xf32, #tpu.memory_space<vmem>>, vector<2x32xf32>
    tpu.vector_store %arg8[%c0_29, %c224], %80 {strides = array<i32>} : memref<2x576xf32, #tpu.memory_space<vmem>>, vector<2x32xf32>,
    %cst_30 = arith.constant dense<0.000000e+00> : vector<2x96xf32>
    %82 = tpu.matmul %79, %6, %cst_30 {dimension_numbers = #tpu.dot_dimension_numbers<[1], [0], [0], [1], [0, 0, 1, 1], [], []>} : vector<2x96xf32>, vector<96x96xf32>, vector<2x96xf32> -> vector<2x96xf32>
    %83 = vector.extract_strided_slice %5 {offsets = [0, 320], sizes = [2, 32], strides = [1, 1]} : vector<2x576xf32> to vector<2x32xf32>
    %84 = tpu.concatenate %83, %9 in 1 : vector<2x32xf32>, vector<2x64xf32> -> vector<2x96xf32>
    %85 = arith.addf %82, %84 : vector<2x96xf32>
    %86 = math.tanh %85 : vector<2x96xf32>
    %87 = vector.extract_strided_slice %86 {offsets = [0, 64], sizes = [2, 32], strides = [1, 1]} : vector<2x96xf32> to vector<2x32xf32>
    %c0_31 = arith.constant 0 : index
    %c256 = arith.constant 256 : index
    %88 = vector.load %arg8[%c0_31, %c256] : memref<2x576xf32, #tpu.memory_space<vmem>>, vector<2x32xf32>
    tpu.vector_store %arg8[%c0_31, %c256], %87 {strides = array<i32>} : memref<2x576xf32, #tpu.memory_space<vmem>>, vector<2x32xf32>,
    %cst_32 = arith.constant dense<0.000000e+00> : vector<2x96xf32>
    %89 = tpu.matmul %86, %6, %cst_32 {dimension_numbers = #tpu.dot_dimension_numbers<[1], [0], [0], [1], [0, 0, 1, 1], [], []>} : vector<2x96xf32>, vector<96x96xf32>, vector<2x96xf32> -> vector<2x96xf32>
    %90 = vector.extract_strided_slice %5 {offsets = [0, 352], sizes = [2, 32], strides = [1, 1]} : vector<2x576xf32> to vector<2x32xf32>
    %91 = tpu.concatenate %90, %9 in 1 : vector<2x32xf32>, vector<2x64xf32> -> vector<2x96xf32>
    %92 = arith.addf %89, %91 : vector<2x96xf32>
    %93 = math.tanh %92 : vector<2x96xf32>
    %94 = vector.extract_strided_slice %93 {offsets = [0, 64], sizes = [2, 32], strides = [1, 1]} : vector<2x96xf32> to vector<2x32xf32>
    %c0_33 = arith.constant 0 : index
    %c288 = arith.constant 288 : index
    %95 = vector.load %arg8[%c0_33, %c288] : memref<2x576xf32, #tpu.memory_space<vmem>>, vector<2x32xf32>
    tpu.vector_store %arg8[%c0_33, %c288], %94 {strides = array<i32>} : memref<2x576xf32, #tpu.memory_space<vmem>>, vector<2x32xf32>,
    %cst_34 = arith.constant dense<0.000000e+00> : vector<2x96xf32>
    %96 = tpu.matmul %93, %6, %cst_34 {dimension_numbers = #tpu.dot_dimension_numbers<[1], [0], [0], [1], [0, 0, 1, 1], [], []>} : vector<2x96xf32>, vector<96x96xf32>, vector<2x96xf32> -> vector<2x96xf32>
    %97 = vector.extract_strided_slice %5 {offsets = [0, 384], sizes = [2, 32], strides = [1, 1]} : vector<2x576xf32> to vector<2x32xf32>
    %98 = tpu.concatenate %97, %9 in 1 : vector<2x32xf32>, vector<2x64xf32> -> vector<2x96xf32>
    %99 = arith.addf %96, %98 : vector<2x96xf32>
    %100 = math.tanh %99 : vector<2x96xf32>
    %101 = vector.extract_strided_slice %100 {offsets = [0, 64], sizes = [2, 32], strides = [1, 1]} : vector<2x96xf32> to vector<2x32xf32>
    %c0_35 = arith.constant 0 : index
    %c320 = arith.constant 320 : index
    %102 = vector.load %arg8[%c0_35, %c320] : memref<2x576xf32, #tpu.memory_space<vmem>>, vector<2x32xf32>
    tpu.vector_store %arg8[%c0_35, %c320], %101 {strides = array<i32>} : memref<2x576xf32, #tpu.memory_space<vmem>>, vector<2x32xf32>,
    %cst_36 = arith.constant dense<0.000000e+00> : vector<2x96xf32>
    %103 = tpu.matmul %100, %6, %cst_36 {dimension_numbers = #tpu.dot_dimension_numbers<[1], [0], [0], [1], [0, 0, 1, 1], [], []>} : vector<2x96xf32>, vector<96x96xf32>, vector<2x96xf32> -> vector<2x96xf32>
    %104 = vector.extract_strided_slice %5 {offsets = [0, 416], sizes = [2, 32], strides = [1, 1]} : vector<2x576xf32> to vector<2x32xf32>
    %105 = tpu.concatenate %104, %9 in 1 : vector<2x32xf32>, vector<2x64xf32> -> vector<2x96xf32>
    %106 = arith.addf %103, %105 : vector<2x96xf32>
    %107 = math.tanh %106 : vector<2x96xf32>
    %108 = vector.extract_strided_slice %107 {offsets = [0, 64], sizes = [2, 32], strides = [1, 1]} : vector<2x96xf32> to vector<2x32xf32>
    %c0_37 = arith.constant 0 : index
    %c352 = arith.constant 352 : index
    %109 = vector.load %arg8[%c0_37, %c352] : memref<2x576xf32, #tpu.memory_space<vmem>>, vector<2x32xf32>
    tpu.vector_store %arg8[%c0_37, %c352], %108 {strides = array<i32>} : memref<2x576xf32, #tpu.memory_space<vmem>>, vector<2x32xf32>,
    %cst_38 = arith.constant dense<0.000000e+00> : vector<2x96xf32>
    %110 = tpu.matmul %107, %6, %cst_38 {dimension_numbers = #tpu.dot_dimension_numbers<[1], [0], [0], [1], [0, 0, 1, 1], [], []>} : vector<2x96xf32>, vector<96x96xf32>, vector<2x96xf32> -> vector<2x96xf32>
    %111 = vector.extract_strided_slice %5 {offsets = [0, 448], sizes = [2, 32], strides = [1, 1]} : vector<2x576xf32> to vector<2x32xf32>
    %112 = tpu.concatenate %111, %9 in 1 : vector<2x32xf32>, vector<2x64xf32> -> vector<2x96xf32>
    %113 = arith.addf %110, %112 : vector<2x96xf32>
    %114 = math.tanh %113 : vector<2x96xf32>
    %115 = vector.extract_strided_slice %114 {offsets = [0, 64], sizes = [2, 32], strides = [1, 1]} : vector<2x96xf32> to vector<2x32xf32>
    %c0_39 = arith.constant 0 : index
    %c384 = arith.constant 384 : index
    %116 = vector.load %arg8[%c0_39, %c384] : memref<2x576xf32, #tpu.memory_space<vmem>>, vector<2x32xf32>
    tpu.vector_store %arg8[%c0_39, %c384], %115 {strides = array<i32>} : memref<2x576xf32, #tpu.memory_space<vmem>>, vector<2x32xf32>,
    %cst_40 = arith.constant dense<0.000000e+00> : vector<2x96xf32>
    %117 = tpu.matmul %114, %6, %cst_40 {dimension_numbers = #tpu.dot_dimension_numbers<[1], [0], [0], [1], [0, 0, 1, 1], [], []>} : vector<2x96xf32>, vector<96x96xf32>, vector<2x96xf32> -> vector<2x96xf32>
    %118 = vector.extract_strided_slice %5 {offsets = [0, 480], sizes = [2, 32], strides = [1, 1]} : vector<2x576xf32> to vector<2x32xf32>
    %119 = tpu.concatenate %118, %9 in 1 : vector<2x32xf32>, vector<2x64xf32> -> vector<2x96xf32>
    %120 = arith.addf %117, %119 : vector<2x96xf32>
    %121 = math.tanh %120 : vector<2x96xf32>
    %122 = vector.extract_strided_slice %121 {offsets = [0, 64], sizes = [2, 32], strides = [1, 1]} : vector<2x96xf32> to vector<2x32xf32>
    %c0_41 = arith.constant 0 : index
    %c416 = arith.constant 416 : index
    %123 = vector.load %arg8[%c0_41, %c416] : memref<2x576xf32, #tpu.memory_space<vmem>>, vector<2x32xf32>
    tpu.vector_store %arg8[%c0_41, %c416], %122 {strides = array<i32>} : memref<2x576xf32, #tpu.memory_space<vmem>>, vector<2x32xf32>,
    %cst_42 = arith.constant dense<0.000000e+00> : vector<2x96xf32>
    %124 = tpu.matmul %121, %6, %cst_42 {dimension_numbers = #tpu.dot_dimension_numbers<[1], [0], [0], [1], [0, 0, 1, 1], [], []>} : vector<2x96xf32>, vector<96x96xf32>, vector<2x96xf32> -> vector<2x96xf32>
    %125 = vector.extract_strided_slice %5 {offsets = [0, 512], sizes = [2, 32], strides = [1, 1]} : vector<2x576xf32> to vector<2x32xf32>
    %126 = tpu.concatenate %125, %9 in 1 : vector<2x32xf32>, vector<2x64xf32> -> vector<2x96xf32>
    %127 = arith.addf %124, %126 : vector<2x96xf32>
    %128 = math.tanh %127 : vector<2x96xf32>
    %129 = vector.extract_strided_slice %128 {offsets = [0, 64], sizes = [2, 32], strides = [1, 1]} : vector<2x96xf32> to vector<2x32xf32>
    %c0_43 = arith.constant 0 : index
    %c448 = arith.constant 448 : index
    %130 = vector.load %arg8[%c0_43, %c448] : memref<2x576xf32, #tpu.memory_space<vmem>>, vector<2x32xf32>
    tpu.vector_store %arg8[%c0_43, %c448], %129 {strides = array<i32>} : memref<2x576xf32, #tpu.memory_space<vmem>>, vector<2x32xf32>,
    %cst_44 = arith.constant dense<0.000000e+00> : vector<2x96xf32>
    %131 = tpu.matmul %128, %6, %cst_44 {dimension_numbers = #tpu.dot_dimension_numbers<[1], [0], [0], [1], [0, 0, 1, 1], [], []>} : vector<2x96xf32>, vector<96x96xf32>, vector<2x96xf32> -> vector<2x96xf32>
    %132 = vector.extract_strided_slice %5 {offsets = [0, 544], sizes = [2, 32], strides = [1, 1]} : vector<2x576xf32> to vector<2x32xf32>
    %133 = tpu.concatenate %132, %9 in 1 : vector<2x32xf32>, vector<2x64xf32> -> vector<2x96xf32>
    %134 = arith.addf %131, %133 : vector<2x96xf32>
    %135 = math.tanh %134 : vector<2x96xf32>
    %136 = vector.extract_strided_slice %135 {offsets = [0, 64], sizes = [2, 32], strides = [1, 1]} : vector<2x96xf32> to vector<2x32xf32>
    %c0_45 = arith.constant 0 : index
    %c480 = arith.constant 480 : index
    %137 = vector.load %arg8[%c0_45, %c480] : memref<2x576xf32, #tpu.memory_space<vmem>>, vector<2x32xf32>
    tpu.vector_store %arg8[%c0_45, %c480], %136 {strides = array<i32>} : memref<2x576xf32, #tpu.memory_space<vmem>>, vector<2x32xf32>,
    %cst_46 = arith.constant dense<0.000000e+00> : vector<2x96xf32>
    %138 = tpu.matmul %135, %6, %cst_46 {dimension_numbers = #tpu.dot_dimension_numbers<[1], [0], [0], [1], [0, 0, 1, 1], [], []>} : vector<2x96xf32>, vector<96x96xf32>, vector<2x96xf32> -> vector<2x96xf32>
    %139 = arith.addf %138, %11 : vector<2x96xf32>
    %140 = math.tanh %139 : vector<2x96xf32>
    %141 = vector.extract_strided_slice %140 {offsets = [0, 64], sizes = [2, 32], strides = [1, 1]} : vector<2x96xf32> to vector<2x32xf32>
    %c0_47 = arith.constant 0 : index
    %c512 = arith.constant 512 : index
    %142 = vector.load %arg8[%c0_47, %c512] : memref<2x576xf32, #tpu.memory_space<vmem>>, vector<2x32xf32>
    tpu.vector_store %arg8[%c0_47, %c512], %141 {strides = array<i32>} : memref<2x576xf32, #tpu.memory_space<vmem>>, vector<2x32xf32>,
    %cst_48 = arith.constant dense<0.000000e+00> : vector<2x96xf32>
    %143 = tpu.matmul %140, %6, %cst_48 {dimension_numbers = #tpu.dot_dimension_numbers<[1], [0], [0], [1], [0, 0, 1, 1], [], []>} : vector<2x96xf32>, vector<96x96xf32>, vector<2x96xf32> -> vector<2x96xf32>
    %144 = arith.addf %143, %11 : vector<2x96xf32>
    %145 = math.tanh %144 : vector<2x96xf32>
    %146 = vector.extract_strided_slice %145 {offsets = [0, 64], sizes = [2, 32], strides = [1, 1]} : vector<2x96xf32> to vector<2x32xf32>
    %c0_49 = arith.constant 0 : index
    %c544 = arith.constant 544 : index
    %147 = vector.load %arg8[%c0_49, %c544] : memref<2x576xf32, #tpu.memory_space<vmem>>, vector<2x32xf32>
    tpu.vector_store %arg8[%c0_49, %c544], %146 {strides = array<i32>} : memref<2x576xf32, #tpu.memory_space<vmem>>, vector<2x32xf32>,
    %c0_50 = arith.constant 0 : index
    %c0_51 = arith.constant 0 : index
    %148 = vector.load %arg8[%c0_50, %c0_51] : memref<2x576xf32, #tpu.memory_space<vmem>>, vector<2x576xf32>
    %c0_52 = arith.constant 0 : index
    %c0_53 = arith.constant 0 : index
    %149 = vector.load %arg5[%c0_52, %c0_53] : memref<576x36xf32, #tpu.memory_space<vmem>>, vector<576x36xf32>
    %cst_54 = arith.constant dense<0.000000e+00> : vector<2x36xf32>
    %150 = tpu.matmul %148, %149, %cst_54 {dimension_numbers = #tpu.dot_dimension_numbers<[1], [0], [0], [1], [0, 0, 1, 1], [], []>} : vector<2x576xf32>, vector<576x36xf32>, vector<2x36xf32> -> vector<2x36xf32>
    %c0_55 = arith.constant 0 : index
    %c0_56 = arith.constant 0 : index
    %151 = vector.load %arg6[%c0_55, %c0_56] : memref<1x36xf32, #tpu.memory_space<vmem>>, vector<1x36xf32>
    %152 = vector.broadcast %151 : vector<1x36xf32> to vector<2x36xf32>
    %153 = arith.addf %150, %152 : vector<2x36xf32>
    %c0_57 = arith.constant 0 : index
    %c0_58 = arith.constant 0 : index
    %154 = vector.load %arg7[%c0_57, %c0_58] : memref<2x36xf32, #tpu.memory_space<vmem>>, vector<2x36xf32>
    tpu.vector_store %arg7[%c0_57, %c0_58], %153 {strides = array<i32>} : memref<2x36xf32, #tpu.memory_space<vmem>>, vector<2x36xf32>,
    return
  }
}

</mosaic_0001>

<bundles_post_ra>
// kernel: ensemble_rnn_forward.1
= control target key start
LH: loop header
LB: loop body
LE: loop exit
PB: predicated region body
PF: predicated region fallthrough
CT: control target
= control target key end

     0   :  { %12 = vsyncpa [#allocation4], 0  ;;  %s4303_s24 = smov [#allocation3]   ;;  %s5128_s0 = inlined_call_operand.vmem [shape: f32[2,288], index: 0, kind: input, shape index: {}]   ;;  %s5129_s1 = inlined_call_operand.hbm [shape: f32[288,576], index: 1, kind: input, shape index: {}]   ;;  %s5130_s2 = inlined_call_operand.vmem [shape: f32[1,576], index: 2, kind: input, shape index: {}]   ;;  %s5131_s3 = inlined_call_operand.vmem [shape: f32[96,96], index: 3, kind: input, shape index: {}]   ;;  %s5132_s4 = inlined_call_operand.vmem [shape: f32[1,64], index: 4, kind: input, shape index: {}]   ;;  %s5133_s5 = inlined_call_operand.vmem [shape: f32[576,36], index: 5, kind: input, shape index: {}]   ;;  %s5134_s6 = inlined_call_operand.vmem [shape: f32[1,36], index: 6, kind: input, shape index: {}]   ;;  %s5135_s7 = inlined_call_operand.vmem [shape: f32[2,36], index: 7, kind: output, shape index: {}]  }
   0x1   :  { %s20_s25 = sshll.u32 %s4303_s24, 4  ;;  %s4279_s28 = scalar_lea.hbm %s5129_s1, 23040  ;;  %s21_s25 = int_to_ptr.vmem [resolvable:$true] %s20_s25 }
   0x2   :  { %p4280_p0 = scmp.ne.s32.totalorder %s5129_s1, %s4279_s28  ;;  %p4283_p1 = scmp.lt.u32.totalorder %s4279_s28, %s5129_s1 }
   0x4   :  { %p4285_p2 = pnand %p4283_p1, %p4280_p0 }
   0x6   :  { %4288 = shalt.err (!%p4285_p2)
}
   0x7   :  { %s4289_s10 = scalar_lea.vmem %s21_s25, 23040  ;;  %p4294_p4 = scmp.lt.s32.totalorder %s21_s25, %s21_s25 }
   0x8   :  { %p4290_p3 = scmp.ne.s32.totalorder %s21_s25, %s4289_s10  ;;  %p4295_p5 = scmp.lt.s32.totalorder %s4289_s10, %s4289_s10 }
   0xa   :  { %p4296_p6 = por %p4295_p5, %p4294_p4 }
   0xc   :  { %p4297_p7 = pnand %p4296_p6, %p4290_p3 }
   0xe   :  { %4300 = shalt.err (!%p4297_p7)
}
   0xf   :  { %s4304_s11 = smov 640   ;;  %s4305_s12 = smov 40  }
  0x10   :  { %26 = dma.hbm_to_vmem [thread:$0]  %s5129_s1, 23040, %s21_s25, [#allocation4], %s4304_s11, %s4304_s11, %s4305_s12  }
  0x11   :  { %4301 = dma.done.wait [#allocation4], 23040  }
  0x12   :  { %4302 = vsyncadd [#allocation4], 4294944256  ;;  %v4306_v0 = vmov 0.0   ;;  %v42_v1 = vld [vmem:[#allocation3 + $0x8] sm:$0xff]  ;;  %v47_v2 = vld [vmem:[#allocation3 + $0x30] sm:$0xff]  ;;  %v223_v30 = vlaneseq  ;;  %vm267_vm0 = vcmask 261120  }
  0x13   :  { %405 = vmatprep.mubr.f32.mxu1 %v4306_v0  ;;  %v41_v3 = vld [vmem:[#allocation3] sm:$0xff]  ;;  %v3619_v4 = vpack.c.bf16 %v47_v2, %v42_v1  ;;  %v46_v5 = vld [vmem:[#allocation3 + $0x28] sm:$0xff]  ;;  %v52_v6 = vld [vmem:[#allocation3 + $0x58] sm:$0xff]  ;;  %v4307_v31 = vmov 1983009808   ;;  %s4308_s17 = smov 32  }
  0x14   :  { %v57_v7 = vld [vmem:[#allocation3 + $0x80] sm:$0xff]  ;;  %v3621_v8 = vpack.c.bf16 %v46_v5, %v41_v3  ;;  %v51_v10 = vld [vmem:[#allocation3 + $0x50] sm:$0xff]  ;;  %v56_v11 = vld [vmem:[#allocation3 + $0x78] sm:$0xff]  ;;  %v251_v32 = vunpack.c.l.s4 %v4307_v31  ;;  %v4367_v39 = vshrl.u32 %v223_v30, 7  ;;  %vm4310_vm1 = vmmov 0   ;;  %s4312_s18 = smov 96  }
  0x15   :  { %v3623_v9 = vpack.c.bf16 %v57_v7, %v52_v6  ;;  %v62_v12 = vld [vmem:[#allocation3 + $0xa8] sm:$0xff]  ;;  %3620 = vmatprep.subr.bf16.mxu0 %v3619_v4  ;;  %v67_v13 = vld [vmem:[#allocation3 + $0xd0] sm:$0xff]  ;;  %v3625_v14 = vpack.c.bf16 %v56_v11, %v51_v10  ;;  %v61_v16 = vld [vmem:[#allocation3 + $0xa0] sm:$0xff]  ;;  %vm725_vm2 = vcmask 785408   ;;  %vm891_vm4 = vcmask 254976  }
  0x16   :  { %3622 = vmatpush1.bf16.msra.mxu0 %v3621_v8  ;;  %v3627_v15 = vpack.c.bf16 %v67_v13, %v62_v12  ;;  %v66_v17 = vld [vmem:[#allocation3 + $0xc8] sm:$0xff]  ;;  %v72_v18 = vld [vmem:[#allocation3 + $0xf8] sm:$0xff]  ;;  %v77_v19 = vld [vmem:[#allocation3 + $0x120] sm:$0xff]  ;;  %v252_v40 = vunpack.c.0.s8 %v251_v32  ;;  %vm981_vm5 = vcmask 517376   ;;  %vm1057_vm6 = vcmask 779776  }
  0x17   :  { %3624 = vmatprep.subr.bf16.mxu0 %v3623_v9  ;;  %v3629_v20 = vpack.c.bf16 %v66_v17, %v61_v16  ;;  %v3631_v21 = vpack.c.bf16 %v77_v19, %v72_v18  ;;  %v71_v22 = vld [vmem:[#allocation3 + $0xf0] sm:$0xff]  ;;  %v76_v23 = vld [vmem:[#allocation3 + $0x118] sm:$0xff]  ;;  %v82_v24 = vld [vmem:[#allocation3 + $0x148] sm:$0xff]  ;;  %vm1149_vm7 = vcmask 1042176   ;;  %vm2464_vm8 = vcmask 523264  }
  0x18   :  { %v87_v25 = vld [vmem:[#allocation3 + $0x170] sm:$0xff]  ;;  %v3633_v26 = vpack.c.bf16 %v76_v23, %v71_v22  ;;  %v81_v28 = vld [vmem:[#allocation3 + $0x140] sm:$0xff]  ;;  %v86_v29 = vld [vmem:[#allocation3 + $0x168] sm:$0xff]  ;;  %v4370_v52 = vsub.s32 %v252_v40, %v4367_v39  ;;  %vm2677_vm9 = vcmask 287744  }
  0x19   :  { %v3635_v27 = vpack.c.bf16 %v87_v25, %v82_v24  ;;  %v92_v33 = vld [vmem:[#allocation3 + $0x198] sm:$0xff]  ;;  %v97_v34 = vld [vmem:[#allocation3 + $0x1c0] sm:$0xff]  ;;  %v3637_v35 = vpack.c.bf16 %v86_v29, %v81_v28  ;;  %v91_v37 = vld [vmem:[#allocation3 + $0x190] sm:$0xff] }
  0x1a   :  { %3626 = vmatpush1.bf16.msra.mxu0 %v3625_v14  ;;  %v3639_v36 = vpack.c.bf16 %v97_v34, %v92_v33  ;;  %v96_v38 = vld [vmem:[#allocation3 + $0x1b8] sm:$0xff]  ;;  %v102_v41 = vld [vmem:[#allocation3 + $0x1e8] sm:$0xff]  ;;  %v107_v42 = vld [vmem:[#allocation3 + $0x210] sm:$0xff] }
  0x1b   :  { %3628 = vmatprep.subr.bf16.mxu0 %v3627_v15  ;;  %v3641_v43 = vpack.c.bf16 %v96_v38, %v91_v37  ;;  %v202_v44 = vld [vmem:[#allocation3 + $0x508] sm:$0xff]  ;;  %v207_v45 = vld [vmem:[#allocation3 + $0x530] sm:$0xff]  ;;  %v201_v46 = vld [vmem:[#allocation3 + $0x500] sm:$0xff]  ;;  %v3643_v47 = vpack.c.bf16 %v107_v42, %v102_v41 }
  0x1c   :  { %v101_v48 = vld [vmem:[#allocation3 + $0x1e0] sm:$0xff]  ;;  %v106_v49 = vld [vmem:[#allocation3 + $0x208] sm:$0xff]  ;;  %v3683_v50 = vpack.c.bf16 %v207_v45, %v202_v44  ;;  %v112_v53 = vld [vmem:[#allocation3 + $0x238] sm:$0xff] }
  0x1d   :  { %v206_v51 = vld [vmem:[#allocation3 + $0x528] sm:$0xff]  ;;  %v117_v54 = vld [vmem:[#allocation3 + $0x260] sm:$0xff]  ;;  %v212_v56 = vld [vmem:[#allocation3 + $0x558] sm:$0xff]  ;;  %v3645_v62 = vpack.c.bf16 %v106_v49, %v101_v48 }
  0x1e   :  { %3630 = vmatpush1.bf16.msra.mxu0 %v3629_v20  ;;  %v3685_v55 = vpack.c.bf16 %v206_v51, %v201_v46  ;;  %v111_v57 = vld [vmem:[#allocation3 + $0x230] sm:$0xff]  ;;  %v116_v58 = vld [vmem:[#allocation3 + $0x258] sm:$0xff]  ;;  %3684 = vmatprep.subr.bf16.mxu1 %v3683_v50  ;;  %v217_v59 = vld [vmem:[#allocation3 + $0x580] sm:$0xff]  ;;  %v3647_v5 = vpack.c.bf16 %v117_v54, %v112_v53 }
  0x1f   :  { %3632 = vmatprep.subr.bf16.mxu0 %v3631_v21  ;;  %v211_v60 = vld [vmem:[#allocation3 + $0x550] sm:$0xff]  ;;  %v216_v61 = vld [vmem:[#allocation3 + $0x578] sm:$0xff]  ;;  %v3687_v63 = vpack.c.bf16 %v217_v59, %v212_v56  ;;  %v49_v4 = vld [vmem:[#allocation3 + $0x40] sm:$0xff]  ;;  %v3649_v17 = vpack.c.bf16 %v116_v58, %v111_v57 }
  0x20   :  { %3686 = vmatpush1.bf16.msra.mxu1 %v3685_v55  ;;  %v3689_v1 = vpack.c.bf16 %v216_v61, %v211_v60  ;;  %v40_v2 = vld [vmem:[%s5128_s0] sm:$0x3f]  ;;  %v122_v6 = vld [vmem:[#allocation3 + $0x288] sm:$0xff]  ;;  %v121_v18 = vld [vmem:[#allocation3 + $0x280] sm:$0xff] }
  0x21   :  { %v44_v3 = vld [vmem:[#allocation3 + $0x18] sm:$0xff]  ;;  %v4376_v7 = vrot.slane %v40_v2, %v4370_v52  ;;  %v249_v8 = vcombine.high %v40_v2, %v40_v2  ;;  %v43_v9 = vld [vmem:[#allocation3 + $0x10] sm:$0xff]  ;;  %3688 = vmatprep.subr.bf16.mxu1 %v3687_v63  ;;  %v54_v13 = vld [vmem:[#allocation3 + $0x68] sm:$0xff] }
  0x22   :  { %3634 = vmatpush1.bf16.msra.mxu0 %v3633_v26  ;;  %v48_v10 = vld [vmem:[#allocation3 + $0x38] sm:$0xff]  ;;  %v127_v11 = vld [vmem:[#allocation3 + $0x2b0] sm:$0xff]  ;;  %v3691_v12 = vpack.c.bf16 %v49_v4, %v44_v3  ;;  %v126_v19 = vld [vmem:[#allocation3 + $0x2a8] sm:$0xff] }
  0x23   :  { %3636 = vmatprep.subr.bf16.mxu0 %v3635_v27  ;;  %v59_v14 = vld [vmem:[#allocation3 + $0x90] sm:$0xff]  ;;  %v4380_v15 = vcombine.high %v4376_v7, %v4376_v7  ;;  %v4383_v16 = vrot.slane %v249_v8, %v4370_v52  ;;  %v3693_v20 = vpack.c.bf16 %v48_v10, %v43_v9  ;;  %v3651_v21 = vpack.c.bf16 %v127_v11, %v122_v6  ;;  %v132_v22 = vld [vmem:[#allocation3 + $0x2d8] sm:$0xff]  ;;  %v53_v24 = vld [vmem:[#allocation3 + $0x60] sm:$0xff] }
  0x24   :  { %3690 = vmatpush1.bf16.msra.mxu1 %v3689_v1  ;;  %v3695_v23 = vpack.c.bf16 %v59_v14, %v54_v13  ;;  %v58_v25 = vld [vmem:[#allocation3 + $0x88] sm:$0xff]  ;;  %v137_v26 = vld [vmem:[#allocation3 + $0x300] sm:$0xff]  ;;  %v64_v27 = vld [vmem:[#allocation3 + $0xb8] sm:$0xff]  ;;  %v3653_v29 = vpack.c.bf16 %v126_v19, %v121_v18 }
  0x25   :  { %334 = vmatprep.mubr.f32.mxu0 %v4380_v15  ;;  %3692 = vmatprep.subr.bf16.mxu1 %v3691_v12  ;;  %v69_v28 = vld [vmem:[#allocation3 + $0xe0] sm:$0xff]  ;;  %v131_v31 = vld [vmem:[#allocation3 + $0x2d0] sm:$0xff]  ;;  %v136_v32 = vld [vmem:[#allocation3 + $0x2f8] sm:$0xff]  ;;  %v3697_v33 = vpack.c.bf16 %v58_v25, %v53_v24  ;;  %v3655_v34 = vpack.c.bf16 %v137_v26, %v132_v22 }
  0x26   :  { %3638 = vmatpush1.bf16.msra.mxu0 %v3637_v35  ;;  %v142_v35 = vld [vmem:[#allocation3 + $0x328] sm:$0xff]  ;;  %v63_v37 = vld [vmem:[#allocation3 + $0xb0] sm:$0xff]  ;;  %v68_v38 = vld [vmem:[#allocation3 + $0xd8] sm:$0xff] }
  0x27   :  { %3640 = vmatprep.subr.bf16.mxu0 %v3639_v36  ;;  %2684 = vmatmul.mubr.msk.f32.vlgmr.msra.gmra.mrb[0].mxu1 %vm267_vm0, %v4383_v16  ;;  %v3699_v36 = vpack.c.bf16 %v69_v28, %v64_v27  ;;  %v147_v40 = vld [vmem:[#allocation3 + $0x350] sm:$0xff]  ;;  %v74_v41 = vld [vmem:[#allocation3 + $0x108] sm:$0xff]  ;;  %v141_v44 = vld [vmem:[#allocation3 + $0x320] sm:$0xff]  ;;  %v3701_v46 = vpack.c.bf16 %v68_v38, %v63_v37 }
  0x28   :  { %3694 = vmatpush1.bf16.msra.mxu1 %v3693_v20  ;;  %v79_v42 = vld [vmem:[#allocation3 + $0x130] sm:$0xff]  ;;  %476 = vmatprep.mubr.f32.mxu1 %v4380_v15  ;;  %v146_v45 = vld [vmem:[#allocation3 + $0x348] sm:$0xff]  ;;  %v152_v48 = vld [vmem:[#allocation3 + $0x378] sm:$0xff] }
  0x29   :  { %3696 = vmatprep.subr.bf16.mxu1 %v3695_v23  ;;  %v3703_v49 = vpack.c.bf16 %v79_v42, %v74_v41  ;;  %v73_v50 = vld [vmem:[#allocation3 + $0x100] sm:$0xff]  ;;  %v78_v51 = vld [vmem:[#allocation3 + $0x128] sm:$0xff]  ;;  %v84_v54 = vld [vmem:[#allocation3 + $0x158] sm:$0xff]  ;;  %v3661_v56 = vpack.c.bf16 %v146_v45, %v141_v44 }
  0x2a   :  { %3642 = vmatpush1.bf16.msra.mxu0 %v3641_v43  ;;  %v3657_v43 = vpack.c.bf16 %v136_v32, %v131_v31  ;;  %v157_v53 = vld [vmem:[#allocation3 + $0x3a0] sm:$0xff]  ;;  %v151_v57 = vld [vmem:[#allocation3 + $0x370] sm:$0xff]  ;;  %v156_v58 = vld [vmem:[#allocation3 + $0x398] sm:$0xff]  ;;  %v3705_v59 = vpack.c.bf16 %v78_v51, %v73_v50 }
  0x2b   :  { %3644 = vmatprep.subr.bf16.mxu0 %v3643_v47  ;;  %v3659_v47 = vpack.c.bf16 %v147_v40, %v142_v35  ;;  %v89_v55 = vld [vmem:[#allocation3 + $0x180] sm:$0xff]  ;;  %v3663_v60 = vpack.c.bf16 %v157_v53, %v152_v48  ;;  %v162_v61 = vld [vmem:[#allocation3 + $0x3c8] sm:$0xff]  ;;  %v83_v63 = vld [vmem:[#allocation3 + $0x150] sm:$0xff] }
  0x2c   :  { %3698 = vmatpush1.bf16.msra.mxu1 %v3697_v33  ;;  %v88_v1 = vld [vmem:[#allocation3 + $0x178] sm:$0xff]  ;;  %v167_v2 = vld [vmem:[#allocation3 + $0x3f0] sm:$0xff]  ;;  %v94_v3 = vld [vmem:[#allocation3 + $0x1a8] sm:$0xff] }
  0x2d   :  { %3700 = vmatprep.subr.bf16.mxu1 %v3699_v36  ;;  %v99_v4 = vld [vmem:[#allocation3 + $0x1d0] sm:$0xff]  ;;  %v161_v6 = vld [vmem:[#allocation3 + $0x3c0] sm:$0xff]  ;;  %v166_v8 = vld [vmem:[#allocation3 + $0x3e8] sm:$0xff]  ;;  %v3709_v9 = vpack.c.bf16 %v88_v1, %v83_v63  ;;  %v3667_v10 = vpack.c.bf16 %v167_v2, %v162_v61 }
  0x2e   :  { %3646 = vmatpush1.bf16.msra.mxu0 %v3645_v62  ;;  %v3707_v62 = vpack.c.bf16 %v89_v55, %v84_v54  ;;  %v172_v11 = vld [vmem:[#allocation3 + $0x418] sm:$0xff]  ;;  %v3711_v12 = vpack.c.bf16 %v99_v4, %v94_v3  ;;  %v93_v13 = vld [vmem:[#allocation3 + $0x1a0] sm:$0xff]  ;;  %v98_v14 = vld [vmem:[#allocation3 + $0x1c8] sm:$0xff]  ;;  %v3669_v20 = vpack.c.bf16 %v166_v8, %v161_v6 }
  0x2f   :  { %3648 = vmatprep.subr.bf16.mxu0 %v3647_v5  ;;  %v3665_v5 = vpack.c.bf16 %v156_v58, %v151_v57  ;;  %v104_v18 = vld [vmem:[#allocation3 + $0x1f8] sm:$0xff]  ;;  %v109_v19 = vld [vmem:[#allocation3 + $0x220] sm:$0xff]  ;;  %v3713_v23 = vpack.c.bf16 %v98_v14, %v93_v13  ;;  %v182_v25 = vld [vmem:[#allocation3 + $0x468] sm:$0xff] }
  0x30   :  { %3702 = vmatpush1.bf16.msra.mxu1 %v3701_v46  ;;  %v176_v22 = vld [vmem:[#allocation3 + $0x438] sm:$0xff]  ;;  %v3715_v26 = vpack.c.bf16 %v109_v19, %v104_v18  ;;  %v103_v27 = vld [vmem:[#allocation3 + $0x1f0] sm:$0xff]  ;;  %v114_v31 = vld [vmem:[#allocation3 + $0x248] sm:$0xff] }
  0x31   :  { %3704 = vmatprep.subr.bf16.mxu1 %v3703_v49  ;;  %v108_v28 = vld [vmem:[#allocation3 + $0x218] sm:$0xff]  ;;  %v119_v32 = vld [vmem:[#allocation3 + $0x270] sm:$0xff]  ;;  %v186_v35 = vld [vmem:[#allocation3 + $0x488] sm:$0xff] }
  0x32   :  { %3650 = vmatpush1.bf16.msra.mxu0 %v3649_v17  ;;  %v177_v17 = vld [vmem:[#allocation3 + $0x440] sm:$0xff]  ;;  %v3717_v36 = vpack.c.bf16 %v108_v28, %v103_v27  ;;  %v192_v38 = vld [vmem:[#allocation3 + $0x4b8] sm:$0xff]  ;;  %v3719_v40 = vpack.c.bf16 %v119_v32, %v114_v31  ;;  %v118_v42 = vld [vmem:[#allocation3 + $0x268] sm:$0xff] }
  0x33   :  { %3652 = vmatprep.subr.bf16.mxu0 %v3651_v21  ;;  %v171_v21 = vld [vmem:[#allocation3 + $0x410] sm:$0xff]  ;;  %v3671_v24 = vpack.c.bf16 %v177_v17, %v172_v11  ;;  %v113_v41 = vld [vmem:[#allocation3 + $0x240] sm:$0xff]  ;;  %v124_v44 = vld [vmem:[#allocation3 + $0x298] sm:$0xff] }
  0x34   :  { %3706 = vmatpush1.bf16.msra.mxu1 %v3705_v59  ;;  %v3673_v33 = vpack.c.bf16 %v176_v22, %v171_v21  ;;  %v129_v45 = vld [vmem:[#allocation3 + $0x2c0] sm:$0xff]  ;;  %v196_v48 = vld [vmem:[#allocation3 + $0x4d8] sm:$0xff]  ;;  %v3721_v49 = vpack.c.bf16 %v118_v42, %v113_v41  ;;  %v123_v53 = vld [vmem:[#allocation3 + $0x290] sm:$0xff] }
  0x35   :  { %3708 = vmatprep.subr.bf16.mxu1 %v3707_v62  ;;  %v3723_v51 = vpack.c.bf16 %v129_v45, %v124_v44  ;;  %v128_v54 = vld [vmem:[#allocation3 + $0x2b8] sm:$0xff]  ;;  %v134_v55 = vld [vmem:[#allocation3 + $0x2e8] sm:$0xff]  ;;  %v125_v57 = vld [vmem:[#allocation3 + $0x2a0] sm:$0xff] }
  0x36   :  { %3654 = vmatpush1.bf16.msra.mxu0 %v3653_v29  ;;  %v187_v29 = vld [vmem:[#allocation3 + $0x490] sm:$0xff]  ;;  %v130_v58 = vld [vmem:[#allocation3 + $0x2c8] sm:$0xff]  ;;  %v3725_v61 = vpack.c.bf16 %v128_v54, %v123_v53  ;;  %v133_v62 = vld [vmem:[#allocation3 + $0x2e0] sm:$0xff] }
  0x37   :  { %3656 = vmatprep.subr.bf16.mxu0 %v3655_v34  ;;  %v181_v34 = vld [vmem:[#allocation3 + $0x460] sm:$0xff]  ;;  %v3675_v37 = vpack.c.bf16 %v187_v29, %v182_v25  ;;  %v2687_v59 = vld [vmem:[%s5132_s4] ss:$0 sm:$0xff]  ;;  %v138_v63 = vld [vmem:[#allocation3 + $0x308] sm:$0xff]  ;;  %v3763_v3 = vpack.c.bf16 %v130_v58, %v125_v57 }
  0x38   :  { %3710 = vmatpush1.bf16.msra.mxu1 %v3709_v9  ;;  %v3677_v46 = vpack.c.bf16 %v186_v35, %v181_v34  ;;  %v144_v2 = vld [vmem:[#allocation3 + $0x338] sm:$0xff]  ;;  %v45_v4 = vld [vmem:[#allocation3 + $0x20] sm:$0xff]  ;;  %v135_v8 = vld [vmem:[#allocation3 + $0x2f0] sm:$0xff]  ;;  %712 = vrot.lane.b32.xlu0 %v2687_v59, %s4308_s17 }
  0x39   :  { %3712 = vmatprep.subr.bf16.mxu1 %v3711_v12  ;;  %v149_v6 = vld [vmem:[#allocation3 + $0x360] sm:$0xff]  ;;  %v140_v9 = vld [vmem:[#allocation3 + $0x318] sm:$0xff]  ;;  %v143_v11 = vld [vmem:[#allocation3 + $0x330] sm:$0xff] }
  0x3a   :  { %3658 = vmatpush1.bf16.msra.mxu0 %v3657_v43  ;;  %v197_v43 = vld [vmem:[#allocation3 + $0x4e0] sm:$0xff]  ;;  %v148_v12 = vld [vmem:[#allocation3 + $0x358] sm:$0xff]  ;;  %v3731_v14 = vpack.c.bf16 %v149_v6, %v144_v2  ;;  %v154_v17 = vld [vmem:[#allocation3 + $0x388] sm:$0xff]  ;;  %v3767_v18 = vpack.c.bf16 %v140_v9, %v135_v8 }
  0x3b   :  { %3660 = vmatprep.subr.bf16.mxu0 %v3659_v47  ;;  %v191_v47 = vld [vmem:[#allocation3 + $0x4b0] sm:$0xff]  ;;  %v3679_v50 = vpack.c.bf16 %v197_v43, %v192_v38  ;;  %v145_v22 = vld [vmem:[#allocation3 + $0x340] sm:$0xff]  ;;  %v164_v29 = vld [vmem:[#allocation3 + $0x3d8] sm:$0xff] }
  0x3c   :  { %3714 = vmatpush1.bf16.msra.mxu1 %v3713_v23  ;;  %v55_v19 = vld [vmem:[#allocation3 + $0x70] sm:$0xff]  ;;  %v150_v23 = vld [vmem:[#allocation3 + $0x368] sm:$0xff]  ;;  %v153_v25 = vld [vmem:[#allocation3 + $0x380] sm:$0xff] }
  0x3d   :  { %3716 = vmatprep.subr.bf16.mxu1 %v3715_v26  ;;  %v159_v21 = vld [vmem:[#allocation3 + $0x3b0] sm:$0xff]  ;;  %v158_v26 = vld [vmem:[#allocation3 + $0x3a8] sm:$0xff]  ;;  %v3771_v31 = vpack.c.bf16 %v150_v23, %v145_v22  ;;  %v65_v32 = vld [vmem:[#allocation3 + $0xc0] sm:$0xff] }
  0x3e   :  { %3662 = vmatpush1.bf16.msra.mxu0 %v3661_v56  ;;  %v139_v56 = vld [vmem:[#allocation3 + $0x310] sm:$0xff]  ;;  %v3735_v28 = vpack.c.bf16 %v159_v21, %v154_v17  ;;  %v169_v34 = vld [vmem:[#allocation3 + $0x400] sm:$0xff]  ;;  %v174_v43 = vld [vmem:[#allocation3 + $0x428] sm:$0xff] }
  0x3f   :  { %3664 = vmatprep.subr.bf16.mxu0 %v3663_v60  ;;  %v3681_v60 = vpack.c.bf16 %v196_v48, %v191_v47  ;;  %v3727_v1 = vpack.c.bf16 %v139_v56, %v134_v55  ;;  %v155_v35 = vld [vmem:[#allocation3 + $0x390] sm:$0xff]  ;;  %v3739_v42 = vpack.c.bf16 %v169_v34, %v164_v29  ;;  %v165_v48 = vld [vmem:[#allocation3 + $0x3e0] sm:$0xff]  ;;  %v184_v55 = vld [vmem:[#allocation3 + $0x478] sm:$0xff] }
  0x40   :  { %3718 = vmatpush1.bf16.msra.mxu1 %v3717_v36  ;;  %v160_v36 = vld [vmem:[#allocation3 + $0x3b8] sm:$0xff]  ;;  %v163_v38 = vld [vmem:[#allocation3 + $0x3d0] sm:$0xff]  ;;  %v85_v57 = vld [vmem:[#allocation3 + $0x160] sm:$0xff] }
  0x41   :  { %3720 = vmatprep.subr.bf16.mxu1 %v3719_v40  ;;  %v168_v40 = vld [vmem:[#allocation3 + $0x3f8] sm:$0xff]  ;;  %v3775_v44 = vpack.c.bf16 %v160_v36, %v155_v35  ;;  %v75_v45 = vld [vmem:[#allocation3 + $0x110] sm:$0xff]  ;;  %v90_v58 = vld [vmem:[#allocation3 + $0x188] sm:$0xff] }
  0x42   :  { %3666 = vmatpush1.bf16.msra.mxu0 %v3665_v5  ;;  %v50_v5 = vld [vmem:[#allocation3 + $0x48] sm:$0xff]  ;;  %v179_v47 = vld [vmem:[#allocation3 + $0x450] sm:$0xff]  ;;  %v189_v59 = vld [vmem:[#allocation3 + $0x4a0] sm:$0xff]  ;;  %v3781_v2 = vpack.c.bf16 %v90_v58, %v85_v57 }
  0x43   :  { %3668 = vmatprep.subr.bf16.mxu0 %v3667_v10  ;;  %v3729_v10 = vpack.c.bf16 %v138_v63, %v133_v62  ;;  %v3765_v13 = vpack.c.bf16 %v50_v5, %v45_v4  ;;  %v3743_v54 = vpack.c.bf16 %v179_v47, %v174_v43  ;;  %v183_v63 = vld [vmem:[#allocation3 + $0x470] sm:$0xff]  ;;  %v194_v4 = vld [vmem:[#allocation3 + $0x4c8] sm:$0xff]  ;;  %v100_v8 = vld [vmem:[#allocation3 + $0x1d8] sm:$0xff] }
  0x44   :  { %3722 = vmatpush1.bf16.msra.mxu1 %v3721_v49  ;;  %v170_v49 = vld [vmem:[#allocation3 + $0x408] sm:$0xff]  ;;  %v95_v6 = vld [vmem:[#allocation3 + $0x1b0] sm:$0xff]  ;;  %v105_v21 = vld [vmem:[#allocation3 + $0x200] sm:$0xff] }
  0x45   :  { %3724 = vmatprep.subr.bf16.mxu1 %v3723_v51  ;;  %v173_v51 = vld [vmem:[#allocation3 + $0x420] sm:$0xff]  ;;  %v3779_v56 = vpack.c.bf16 %v170_v49, %v165_v48  ;;  %v199_v9 = vld [vmem:[#allocation3 + $0x4f0] sm:$0xff]  ;;  %v3785_v17 = vpack.c.bf16 %v100_v8, %v95_v6  ;;  %v110_v22 = vld [vmem:[#allocation3 + $0x228] sm:$0xff]  ;;  %v4309_v48 = vmov 0.0|0.0   ;;  %v225_v6 = vsub.s32 0, %v4367_v39 }
  0x46   :  { %3670 = vmatpush1.bf16.msra.mxu0 %v3669_v20  ;;  %v60_v20 = vld [vmem:[#allocation3 + $0x98] sm:$0xff]  ;;  %v209_v23 = vld [vmem:[#allocation3 + $0x540] sm:$0xff]  ;;  %v203_v29 = vld [vmem:[#allocation3 + $0x510] sm:$0xff] }
  0x47   :  { %3672 = vmatprep.subr.bf16.mxu0 %v3671_v24  ;;  %v3733_v24 = vpack.c.bf16 %v148_v12, %v143_v11  ;;  %v3769_v27 = vpack.c.bf16 %v60_v20, %v55_v19  ;;  %v190_v11 = vld [vmem:[#allocation3 + $0x4a8] sm:$0xff]  ;;  %v204_v19 = vld [vmem:[#allocation3 + $0x518] sm:$0xff]  ;;  %v219_v34 = vld [vmem:[#allocation3 + $0x590] sm:$0xff] }
  0x48   :  { %3726 = vmatpush1.bf16.msra.mxu1 %v3725_v61  ;;  %v180_v61 = vld [vmem:[#allocation3 + $0x458] sm:$0xff]  ;;  %v115_v35 = vld [vmem:[#allocation3 + $0x250] sm:$0xff]  ;;  %v210_v47 = vld [vmem:[#allocation3 + $0x548] sm:$0xff] }
  0x49   :  { %3728 = vmatprep.subr.bf16.mxu1 %v3727_v1  ;;  %v188_v1 = vld [vmem:[#allocation3 + $0x498] sm:$0xff]  ;;  %v700_v58 = vld [vmem:[%s5131_s3 + $0x30] sm:$0xff] }
  0x4a   :  { %3674 = vmatpush1.bf16.msra.mxu0 %v3673_v33  ;;  %v70_v33 = vld [vmem:[#allocation3 + $0xe8] sm:$0xff]  ;;  %v3749_v12 = vpack.c.bf16 %v188_v1, %v183_v63  ;;  %v120_v36 = vld [vmem:[#allocation3 + $0x278] sm:$0xff] }
  0x4b   :  { %3676 = vmatprep.subr.bf16.mxu0 %v3675_v37  ;;  %v3737_v37 = vpack.c.bf16 %v158_v26, %v153_v25  ;;  %v3773_v41 = vpack.c.bf16 %v70_v33, %v65_v32  ;;  %v200_v25 = vld [vmem:[#allocation3 + $0x4f8] sm:$0xff]  ;;  %v214_v32 = vld [vmem:[#allocation3 + $0x568] sm:$0xff] }
  0x4c   :  { %3730 = vmatpush1.bf16.msra.mxu1 %v3729_v10  ;;  %v185_v10 = vld [vmem:[#allocation3 + $0x480] sm:$0xff]  ;;  %v221_v8 = vld [vmem:[%s5130_s2] sm:$0x1f] }
  0x4d   :  { %3732 = vmatprep.subr.bf16.mxu1 %v3731_v14  ;;  %v198_v14 = vld [vmem:[#allocation3 + $0x4e8] sm:$0xff]  ;;  %v3787_v20 = vpack.c.bf16 %v190_v11, %v185_v10  ;;  %v699_v57 = vld [vmem:[%s5131_s3 + $0x28] sm:$0xff]  ;;  %v226_v10 = vrot.slane %v221_v8, %v225_v6 }
  0x4e   :  { %3678 = vmatpush1.bf16.msra.mxu0 %v3677_v46  ;;  %v80_v46 = vld [vmem:[#allocation3 + $0x138] sm:$0xff]  ;;  %v704_v1 = vld [vmem:[%s5131_s3 + $0x50] sm:$0xff] }
  0x4f   :  { %3680 = vmatprep.subr.bf16.mxu0 %v3679_v50  ;;  %v3741_v50 = vpack.c.bf16 %v168_v40, %v163_v38  ;;  %v3777_v53 = vpack.c.bf16 %v80_v46, %v75_v45  ;;  %v3759_v38 = vpack.c.bf16 %v219_v34, %v214_v32  ;;  %v213_v40 = vld [vmem:[#allocation3 + $0x560] sm:$0xff] }
  0x50   :  { %3734 = vmatpush1.bf16.msra.mxu1 %v3733_v24  ;;  %v195_v24 = vld [vmem:[#allocation3 + $0x4d0] sm:$0xff]  ;;  %v695_v45 = vld [vmem:[%s5131_s3 + $0x8] sm:$0xff] }
  0x51   :  { %3736 = vmatprep.subr.bf16.mxu1 %v3735_v28  ;;  %v3755_v28 = vpack.c.bf16 %v209_v23, %v204_v19  ;;  %v3791_v33 = vpack.c.bf16 %v200_v25, %v195_v24  ;;  %v205_v46 = vld [vmem:[#allocation3 + $0x520] sm:$0xff]  ;;  %v237_v23 = vsub.s32 3, %v4367_v39 }
  0x52   :  { %3682 = vmatpush1.bf16.msra.mxu0 %v3681_v60  ;;  %v175_v60 = vld [vmem:[#allocation3 + $0x430] sm:$0xff] }
  0x53   :  { %3764 = vmatprep.subr.bf16.mxu0 %v3763_v3  ;;  %v3747_v3 = vpack.c.bf16 %v189_v59, %v184_v55  ;;  %v3783_v5 = vpack.c.bf16 %v180_v61, %v175_v60  ;;  %v701_v59 = vld [vmem:[%s5131_s3 + $0x38] sm:$0xff]  ;;  %v702_v61 = vld [vmem:[%s5131_s3 + $0x40] sm:$0xff] }
  0x54   :  { %3738 = vmatpush1.bf16.msra.mxu1 %v3737_v37  ;;  %v4454_v60 = vpack.c.bf16 %v701_v59, %v700_v58 }
  0x55   :  { %335 = vmatmul.mubr.f32.vlgmr.msra.gmra.mrb[0].mxu0 %v4376_v7  ;;  %3740 = vmatprep.subr.bf16.mxu1 %v3739_v42  ;;  %v3793_v42 = vpack.c.bf16 %v120_v36, %v115_v35 }
  0x56   :  { %3766 = vmatpush3.bf16.msra.mxu0 %v3765_v13  ;;  %618 = vmatprep.mubr.f32.mxu0 %v4380_v15  ;;  %v178_v15 = vld [vmem:[#allocation3 + $0x448] sm:$0xff]  ;;  %v193_v13 = vld [vmem:[#allocation3 + $0x4c0] sm:$0xff] }
  0x57   :  { %3768 = vmatprep.subr.bf16.mxu0 %v3767_v18  ;;  %v3745_v62 = vpack.c.bf16 %v178_v15, %v173_v51  ;;  %v3751_v18 = vpack.c.bf16 %v199_v9, %v194_v4  ;;  %v3753_v26 = vpack.c.bf16 %v198_v14, %v193_v13  ;;  %v696_v51 = vld [vmem:[%s5131_s3 + $0x10] sm:$0xff]  ;;  %v697_v15 = vld [vmem:[%s5131_s3 + $0x18] sm:$0xff]  ;;  %v229_v9 = vsub.s32 1, %v4367_v39 }
  0x58   :  { %3742 = vmatpush1.bf16.msra.mxu1 %v3741_v50  ;;  %v3796_v50 = vpack.c.bf16 %v210_v47, %v205_v46  ;;  %v717_v46 = vand.u32 127, %v223_v30 }
  0x59   :  { %3744 = vmatprep.subr.bf16.mxu1 %v3743_v54  ;;  %v220_v54 = vld [vmem:[#allocation3 + $0x598] sm:$0xff]  ;;  %v230_v11 = vrot.slane %v221_v8, %v229_v9 }
  0x5a   :  { %3770 = vmatpush3.bf16.msra.mxu0 %v3769_v27  ;;  %v3789_v27 = vpack.c.bf16 %v110_v22, %v105_v21  ;;  %v233_v22 = vsub.s32 2, %v4367_v39  ;;  %vm800_vm3 = vcmp.lt.s32.totalorder %v717_v46, 64 }
  0x5b   :  { %3772 = vmatprep.subr.bf16.mxu0 %v3771_v31  ;;  %v208_v31 = vld [vmem:[#allocation3 + $0x538] sm:$0xff] }
  0x5c   :  { %3746 = vmatpush1.bf16.msra.mxu1 %v3745_v62  ;;  %v3757_v37 = vpack.c.bf16 %v208_v31, %v203_v29  ;;  %v703_v62 = vld [vmem:[%s5131_s3 + $0x48] sm:$0xff]  ;;  %v234_v24 = vrot.slane %v221_v8, %v233_v22 }
  0x5d   :  { %3748 = vmatprep.subr.bf16.mxu1 %v3747_v3  ;;  %v4466_v63 = vpack.c.bf16 %v703_v62, %v702_v61 }
  0x5e   :  { %3774 = vmatpush3.bf16.msra.mxu0 %v3773_v41  ;;  %v218_v41 = vld [vmem:[#allocation3 + $0x588] sm:$0xff] }
  0x5f   :  { %3776 = vmatprep.subr.bf16.mxu0 %v3775_v44  ;;  %v3761_v43 = vpack.c.bf16 %v218_v41, %v213_v40  ;;  %v694_v44 = vld [vmem:[%s5131_s3] sm:$0xff] }
  0x60   :  { %3750 = vmatpush1.bf16.msra.mxu1 %v3749_v12  ;;  %v4404_v49 = vpack.c.bf16 %v695_v45, %v694_v44 }
  0x61   :  { %3752 = vmatprep.subr.bf16.mxu1 %v3751_v18 }
  0x62   :  { %3778 = vmatpush3.bf16.msra.mxu0 %v3777_v53  ;;  %v215_v53 = vld [vmem:[#allocation3 + $0x570] sm:$0xff] }
  0x63   :  { %3780 = vmatprep.subr.bf16.mxu0 %v3779_v56  ;;  %v3799_v55 = vpack.c.bf16 %v220_v54, %v215_v53  ;;  %v698_v56 = vld [vmem:[%s5131_s3 + $0x20] sm:$0xff] }
  0x64   :  { %3754 = vmatpush1.bf16.msra.mxu1 %v3753_v26  ;;  %v241_v26 = vsub.s32 4, %v4367_v39 }
  0x65   :  { %3756 = vmatprep.subr.bf16.mxu1 %v3755_v28  ;;  %v238_v28 = vrot.slane %v221_v8, %v237_v23 }
  0x66   :  { %3782 = vmatpush3.bf16.msra.mxu0 %v3781_v2  ;;  %v705_v2 = vld [vmem:[%s5131_s3 + $0x58] sm:$0xff]  ;;  %s4311_s3 = smov 64   ;;  %v242_v34 = vrot.slane %v221_v8, %v241_v26 }
  0x67   :  { %3784 = vmatprep.subr.bf16.mxu0 %v3783_v5  ;;  %477 = vmatmul.mubr.f32.vlgmr.msra.gmra.mrb[2].mxu1 %v4376_v7  ;;  %v4478_v3 = vpack.c.bf16 %v705_v2, %v704_v1 }
  0x68   :  { %3758 = vmatpush1.bf16.msra.mxu1 %v3757_v37  ;;  %547 = vmatprep.mubr.f32.mxu1 %v4306_v0 }
  0x69   :  { %3760 = vmatprep.subr.bf16.mxu1 %v3759_v38 }
  0x6a   :  { %3786 = vmatpush3.bf16.msra.mxu0 %v3785_v17 }
  0x6b   :  { %3788 = vmatprep.subr.bf16.mxu0 %v3787_v20 }
  0x6c   :  { %3762 = vmatpush1.bf16.msra.mxu1 %v3761_v43 }
  0x6d   :  { %3795 = vmatprep.subr.bf16.mxu1 %v4309_v48 }
  0x6e   :  { %3790 = vmatpush3.bf16.msra.mxu0 %v3789_v27 }
  0x6f   :  { %3792 = vmatprep.subr.bf16.mxu0 %v3791_v33  ;;  %2685 = vmatmul.mubr.msk.f32.vlgmr.msra.gmra.mrb[2].mxu1 %vm267_vm0, %v4383_v16 }
  0x70   :  { %3797 = vmatpush3.bf16.msra.mxu1 %v3796_v50  ;;  %3084 = vmatprep.mubr.msk.f32.mxu1 %vm4310_vm1, %v4306_v0 }
  0x71   :  { %3798 = vmatprep.subr.bf16.mxu1 %v4309_v48 }
  0x72   :  { %3794 = vmatpush3.bf16.msra.mxu0 %v3793_v42 }
  0x73   :  { %3819 = vmatprep.subr.bf16.mxu0 %v4309_v48 }
  0x74   :  { %3800 = vmatpush3.bf16.msra.mxu1 %v3799_v55 }
  0x75   :  { %619 = vmatmul.mubr.f32.vlgmr.msra.gmra.mrb[2].mxu0 %v4376_v7  ;;  %v4420_v7 = vpack.c.bf16 %v697_v15, %v696_v51  ;;  %3801 = vmatprep.subr.bf16.mxu1 %v4309_v48 }
  0x76   :  { %3821 = vmatpush3.bf16.msra.mxu0 %v4404_v49  ;;  %3138 = vmatprep.mubr.msk.f32.mxu0 %vm4310_vm1, %v4306_v0 }
  0x77   :  { %3822 = vmatprep.subr.bf16.mxu0 %v4309_v48  ;;  %3085 = vmatmul.mubr.msk.f32.vlgmr.msra.gmra.mrb[4].mxu1 %vm267_vm0, %v4383_v16  ;;  %v4442_v16 = vpack.c.bf16 %v699_v57, %v698_v56 }
  0x78   :  { %3803 = vmatpush3.bf16.msra.mxu1 %v4404_v49  ;;  %3111 = vmatprep.mubr.msk.f32.mxu1 %vm4310_vm1, %v4306_v0 }
  0x79   :  { %3804 = vmatprep.subr.bf16.mxu1 %v4309_v48 }
  0x7a   :  { %3824 = vmatpush3.bf16.msra.mxu0 %v4420_v7 }
  0x7b   :  { %3825 = vmatprep.subr.bf16.mxu0 %v4309_v48 }
  0x7c   :  { %3806 = vmatpush3.bf16.msra.mxu1 %v4420_v7 }
  0x7d   :  { %3807 = vmatprep.subr.bf16.mxu1 %v4309_v48 }
  0x7e   :  { %3827 = vmatpush3.bf16.msra.mxu0 %v4442_v16 }
  0x7f   :  { %3828 = vmatprep.subr.bf16.mxu0 %v4309_v48 }
  0x80   :  { %3809 = vmatpush3.bf16.msra.mxu1 %v4442_v16 }
  0x81   :  { %3810 = vmatprep.subr.bf16.mxu1 %v4309_v48 }
  0x82   :  { %3830 = vmatpush3.bf16.msra.mxu0 %v4454_v60 }
  0x83   :  { %3831 = vmatprep.subr.bf16.mxu0 %v4309_v48 }
  0x84   :  { %3812 = vmatpush3.bf16.msra.mxu1 %v4454_v60 }
  0x85   :  { %3813 = vmatprep.subr.bf16.mxu1 %v4309_v48 }
  0x86   :  { %3833 = vmatpush3.bf16.msra.mxu0 %v4466_v63 }
  0x87   :  { %3834 = vmatprep.subr.bf16.mxu0 %v4309_v48 }
  0x88   :  { %3815 = vmatpush3.bf16.msra.mxu1 %v4466_v63 }
  0x89   :  { %3816 = vmatprep.subr.bf16.mxu1 %v4309_v48 }
  0x8a   :  { %3836 = vmatpush3.bf16.msra.mxu0 %v4478_v3 }
  0x8b   :  { %3855 = vmatprep.subr.bf16.mxu0 %v4309_v48 }
  0x8c   :  { %3818 = vmatpush3.bf16.msra.mxu1 %v4478_v3 }
  0x8d   :  { %3837 = vmatprep.subr.bf16.mxu1 %v4309_v48 }
  0xaa   :  { %v4539_v40 = vpop.permute.xlu0 %712 }
  0xfa   :  { %v407_v4 = vpop.f32.mrb[0].mxu1 }
  0xfb   :  { %v409_v5 = vpop.f32.mrb[1].mxu1 }
 0x128   :  { %v336_v12 = vpop.f32.mrb[0].mxu0 }
 0x129   :  { %v337_v13 = vadd.f32 %v336_v12, %v226_v10  ;;  %v338_v14 = vpop.f32.mrb[1].mxu0 }
 0x12a   :  { %v339_v17 = vadd.f32 %v338_v14, %v230_v11 }
 0x12b   :  { %v408_v18 = vadd.f32 %v407_v4, %v337_v13 }
 0x12c   :  { %v4489_v19 = vadd.f32 %v409_v5, %v339_v17 }
 0x12d   :  { %4239 = vtanh.f32 %v408_v18  ;;  %802 = vrot.lane.b32.xlu1 %v408_v18, %s4311_s3  ;;  %721 = vrot.lane.b32.xlu0 %v408_v18, %s4312_s18 }
 0x12e   :  { %v983_v12 = vsel %vm267_vm0, %v4489_v19, %v4539_v40 }
 0x131   :  { %893 = vrot.lane.b32.xlu1 %v408_v18, %s4308_s17  ;;  %1060 = vrot.lane.b32.xlu0 %v4489_v19, %s4312_s18 }
 0x135   :  { %1151 = vrot.lane.b32.xlu1 %v4489_v19, %s4311_s3  ;;  %1240 = vrot.lane.b32.xlu0 %v4489_v19, %s4308_s17 }
 0x137   :  { %v4240_v20 = vpop.eup %4239 }
 0x138   :  { %v719_v21 = vsel %vm267_vm0, %v4240_v20, 0.0 }
 0x139   :  { %3112 = vmatmul.mubr.msk.f32.vlgmr.msra.gmra.mrb[6].mxu1 %vm725_vm2, %v719_v21 }
 0x13a   :  { %3839 = vmatpush3.bf16.msra.mxu1 %v4404_v49  ;;  %3165 = vmatprep.mubr.msk.f32.mxu1 %vm4310_vm1, %v4306_v0 }
 0x13b   :  { %3840 = vmatprep.subr.bf16.mxu1 %v4309_v48 }
 0x13e   :  { %3842 = vmatpush3.bf16.msra.mxu1 %v4420_v7 }
 0x13f   :  { %3843 = vmatprep.subr.bf16.mxu1 %v4309_v48 }
 0x142   :  { %3845 = vmatpush3.bf16.msra.mxu1 %v4442_v16  ;;  %v549_v31 = vpop.f32.mrb[2].mxu1 }
 0x143   :  { %3846 = vmatprep.subr.bf16.mxu1 %v4309_v48  ;;  %v4517_v32 = vadd.f32 %v549_v31, %v234_v24  ;;  %v551_v33 = vpop.f32.mrb[3].mxu1 }
 0x144   :  { %v4524_v39 = vadd.f32 %v551_v33, %v238_v28 }
 0x145   :  { %1405 = vrot.lane.b32.xlu1 %v4517_v32, %s4312_s18  ;;  %1495 = vrot.lane.b32.xlu0 %v4517_v32, %s4311_s3 }
 0x146   :  { %3848 = vmatpush3.bf16.msra.mxu1 %v4454_v60 }
 0x147   :  { %3849 = vmatprep.subr.bf16.mxu1 %v4309_v48 }
 0x148   :  { %v2742_v25 = vpop.f32.mrb[2].mxu0 }
 0x149   :  { %v2743_v27 = vpop.f32.mrb[3].mxu0  ;;  %1584 = vrot.lane.b32.xlu1 %v4517_v32, %s4308_s17  ;;  %1749 = vrot.lane.b32.xlu0 %v4524_v39, %s4312_s18 }
 0x14a   :  { %3851 = vmatpush3.bf16.msra.mxu1 %v4466_v63  ;;  %v2744_v29 = vadd.f32 %v2743_v27, %v2742_v25  ;;  %v690_v36 = vpop.f32.mrb[4].mxu1 }
 0x14b   :  { %3852 = vmatprep.subr.bf16.mxu1 %v4309_v48  ;;  %v3086_v38 = vpop.f32.mrb[5].mxu1 }
 0x14c   :  { %v621_v35 = vadd.f32 %v2744_v29, %v242_v34 }
 0x14d   :  { %1839 = vrot.lane.b32.xlu1 %v4524_v39, %s4311_s3  ;;  %1928 = vrot.lane.b32.xlu0 %v4524_v39, %s4308_s17 }
 0x14e   :  { %3854 = vmatpush3.bf16.msra.mxu1 %v4478_v3  ;;  %v4531_v37 = vadd.f32 %v690_v36, %v621_v35 }
 0x14f   :  { %3873 = vmatprep.subr.bf16.mxu1 %v4309_v48 }
 0x151   :  { %2093 = vrot.lane.b32.xlu1 %v4531_v37, %s4312_s18 }
 0x19f   :  { %v722_v41 = vpop.permute.xlu0 %721  ;;  %v803_v30 = vpop.permute.xlu1 %802 }
 0x1a0   :  { %v724_v42 = vsel %vm267_vm0, %v722_v41, %v4539_v40  ;;  %v805_v51 = vsel %vm267_vm0, %v803_v30, %v4539_v40 }
 0x1a3   :  { %v1061_v57 = vpop.permute.xlu0 %1060  ;;  %v894_v2 = vpop.permute.xlu1 %893 }
 0x1a4   :  { %v896_v4 = vsel %vm267_vm0, %v894_v2, %v4539_v40  ;;  %v1063_v19 = vsel %vm267_vm0, %v1061_v57, %v4539_v40 }
 0x1a7   :  { %v4578_v58 = vpop.permute.xlu0 %1240  ;;  %v1152_v26 = vpop.permute.xlu1 %1151 }
 0x1a8   :  { %v1154_v27 = vsel %vm267_vm0, %v1152_v26, %v4539_v40 }
 0x1b7   :  { %v4580_v59 = vpop.permute.xlu0 %1495  ;;  %v1406_v35 = vpop.permute.xlu1 %1405 }
 0x1bb   :  { %v4582_v61 = vpop.permute.xlu0 %1749  ;;  %v4665_v36 = vpop.permute.xlu1 %1584 }
 0x1bf   :  { %v4584_v62 = vpop.permute.xlu0 %1928  ;;  %v4667_v38 = vpop.permute.xlu1 %1839 }
 0x1c3   :  { %v4669_v41 = vpop.permute.xlu1 %2093 }
 0x20c   :  { %v795_v43 = vpop.f32.mrb[6].mxu1 }
 0x20d   :  { %v796_v44 = vadd.f32 %v795_v43, %v724_v42  ;;  %v3113_v45 = vpop.f32.mrb[7].mxu1  ;;  %v1243_v43 = vsel %vm267_vm0, %v4578_v58, %v4539_v40 }
 0x20f   :  { %4241 = vtanh.f32 %v796_v44 }
 0x219   :  { %v4242_v47 = vpop.eup %4241 }
 0x21a   :  { %v801_v50 = vsel %vm800_vm3, %v4242_v47, 0.0 }
 0x21b   :  { %3139 = vmatmul.mubr.msk.f32.vlgmr.msra.gmra.mrb[4].mxu0 %vm725_vm2, %v801_v50 }
 0x21c   :  { %3857 = vmatpush3.bf16.msra.mxu0 %v4404_v49  ;;  %3192 = vmatprep.mubr.msk.f32.mxu0 %vm4310_vm1, %v4306_v0 }
 0x21d   :  { %3858 = vmatprep.subr.bf16.mxu0 %v4309_v48 }
 0x220   :  { %3860 = vmatpush3.bf16.msra.mxu0 %v4420_v7 }
 0x221   :  { %3861 = vmatprep.subr.bf16.mxu0 %v4309_v48 }
 0x224   :  { %3863 = vmatpush3.bf16.msra.mxu0 %v4442_v16 }
 0x225   :  { %3864 = vmatprep.subr.bf16.mxu0 %v4309_v48 }
 0x228   :  { %3866 = vmatpush3.bf16.msra.mxu0 %v4454_v60 }
 0x229   :  { %3867 = vmatprep.subr.bf16.mxu0 %v4309_v48 }
 0x22c   :  { %3869 = vmatpush3.bf16.msra.mxu0 %v4466_v63 }
 0x22d   :  { %3870 = vmatprep.subr.bf16.mxu0 %v4309_v48 }
 0x230   :  { %3872 = vmatpush3.bf16.msra.mxu0 %v4478_v3 }
 0x231   :  { %3891 = vmatprep.subr.bf16.mxu0 %v4309_v48 }
 0x2ee   :  { %v875_v15 = vpop.f32.mrb[4].mxu0 }
 0x2ef   :  { %v876_v53 = vadd.f32 %v875_v15, %v805_v51  ;;  %v3140_v54 = vpop.f32.mrb[5].mxu0  ;;  %v1329_v51 = vsel %vm267_vm0, %v4517_v32, %v4539_v40  ;;  %v1408_v32 = vsel %vm267_vm0, %v1406_v35, %v4539_v40 }
 0x2f1   :  { %4243 = vtanh.f32 %v876_v53 }
 0x2fb   :  { %v4244_v55 = vpop.eup %4243 }
 0x2fc   :  { %3166 = vmatmul.mubr.msk.f32.vlgmr.msra.gmra.mrb[8].mxu1 %vm725_vm2, %v4244_v55  ;;  %v887_v56 = vrot.slane %v4244_v55, %v4370_v52 }
 0x2fd   :  { %3875 = vmatpush3.bf16.msra.mxu1 %v4404_v49  ;;  %3219 = vmatprep.mubr.msk.f32.mxu1 %vm4310_vm1, %v4306_v0 }
 0x2fe   :  { %888 = vrot.lane.b32.xlu0 %v887_v56, %s4311_s3  ;;  %3876 = vmatprep.subr.bf16.mxu1 %v4309_v48 }
 0x301   :  { %3878 = vmatpush3.bf16.msra.mxu1 %v4420_v7 }
 0x302   :  { %3879 = vmatprep.subr.bf16.mxu1 %v4309_v48 }
 0x305   :  { %3881 = vmatpush3.bf16.msra.mxu1 %v4442_v16 }
 0x306   :  { %3882 = vmatprep.subr.bf16.mxu1 %v4309_v48 }
 0x309   :  { %3884 = vmatpush3.bf16.msra.mxu1 %v4454_v60 }
 0x30a   :  { %3885 = vmatprep.subr.bf16.mxu1 %v4309_v48 }
 0x30d   :  { %3887 = vmatpush3.bf16.msra.mxu1 %v4466_v63 }
 0x30e   :  { %3888 = vmatprep.subr.bf16.mxu1 %v4309_v48 }
 0x311   :  { %3890 = vmatpush3.bf16.msra.mxu1 %v4478_v3 }
 0x312   :  { %3909 = vmatprep.subr.bf16.mxu1 %v4309_v48 }
 0x370   :  { %v889_v1 = vpop.permute.xlu0 %888 }
 0x371   :  { %892 = vst.msk [vmem:[#allocation2] sm:$0x3] %vm891_vm4, %v889_v1 }
 0x3cf   :  { %v965_v5 = vpop.f32.mrb[8].mxu1 }
 0x3d0   :  { %v966_v6 = vadd.f32 %v965_v5, %v896_v4  ;;  %v3167_v8 = vpop.f32.mrb[9].mxu1  ;;  %v1498_v5 = vsel %vm267_vm0, %v4580_v59, %v4539_v40 }
 0x3d2   :  { %4245 = vtanh.f32 %v966_v6 }
 0x3dc   :  { %v4246_v9 = vpop.eup %4245 }
 0x3dd   :  { %3193 = vmatmul.mubr.msk.f32.vlgmr.msra.gmra.mrb[6].mxu0 %vm725_vm2, %v4246_v9  ;;  %v977_v10 = vrot.slane %v4246_v9, %v4370_v52 }
 0x3de   :  { %3893 = vmatpush3.bf16.msra.mxu0 %v4404_v49  ;;  %3246 = vmatprep.mubr.msk.f32.mxu0 %vm4310_vm1, %v4306_v0 }
 0x3df   :  { %978 = vrot.lane.b32.xlu0 %v977_v10, %s4312_s18  ;;  %3894 = vmatprep.subr.bf16.mxu0 %v4309_v48 }
 0x3e2   :  { %3896 = vmatpush3.bf16.msra.mxu0 %v4420_v7 }
 0x3e3   :  { %3897 = vmatprep.subr.bf16.mxu0 %v4309_v48 }
 0x3e6   :  { %3899 = vmatpush3.bf16.msra.mxu0 %v4442_v16 }
 0x3e7   :  { %3900 = vmatprep.subr.bf16.mxu0 %v4309_v48 }
 0x3ea   :  { %3902 = vmatpush3.bf16.msra.mxu0 %v4454_v60 }
 0x3eb   :  { %3903 = vmatprep.subr.bf16.mxu0 %v4309_v48 }
 0x3ee   :  { %3905 = vmatpush3.bf16.msra.mxu0 %v4466_v63 }
 0x3ef   :  { %3906 = vmatprep.subr.bf16.mxu0 %v4309_v48 }
 0x3f2   :  { %3908 = vmatpush3.bf16.msra.mxu0 %v4478_v3 }
 0x3f3   :  { %3927 = vmatprep.subr.bf16.mxu0 %v4309_v48 }
 0x451   :  { %v979_v11 = vpop.permute.xlu0 %978 }
 0x452   :  { %982 = vst.msk [vmem:[#allocation2] sm:$0x3] %vm981_vm5, %v979_v11 }
 0x4b0   :  { %v1052_v13 = vpop.f32.mrb[6].mxu0 }
 0x4b1   :  { %v1053_v14 = vadd.f32 %v1052_v13, %v983_v12  ;;  %v3194_v17 = vpop.f32.mrb[7].mxu0  ;;  %v1587_v12 = vsel %vm267_vm0, %v4665_v36, %v4539_v40 }
 0x4b3   :  { %4247 = vtanh.f32 %v1053_v14 }
 0x4bd   :  { %v4248_v18 = vpop.eup %4247 }
 0x4be   :  { %3220 = vmatmul.mubr.msk.f32.vlgmr.msra.gmra.mrb[10].mxu1 %vm725_vm2, %v4248_v18  ;;  %1058 = vst.msk [vmem:[#allocation2] sm:$0x3] %vm1057_vm6, %v4248_v18 }
 0x4bf   :  { %3911 = vmatpush3.bf16.msra.mxu1 %v4404_v49  ;;  %3273 = vmatprep.mubr.msk.f32.mxu1 %vm4310_vm1, %v4306_v0 }
 0x4c0   :  { %3912 = vmatprep.subr.bf16.mxu1 %v4309_v48 }
 0x4c3   :  { %3914 = vmatpush3.bf16.msra.mxu1 %v4420_v7 }
 0x4c4   :  { %3915 = vmatprep.subr.bf16.mxu1 %v4309_v48 }
 0x4c7   :  { %3917 = vmatpush3.bf16.msra.mxu1 %v4442_v16 }
 0x4c8   :  { %3918 = vmatprep.subr.bf16.mxu1 %v4309_v48 }
 0x4cb   :  { %3920 = vmatpush3.bf16.msra.mxu1 %v4454_v60 }
 0x4cc   :  { %3921 = vmatprep.subr.bf16.mxu1 %v4309_v48 }
 0x4cf   :  { %3923 = vmatpush3.bf16.msra.mxu1 %v4466_v63 }
 0x4d0   :  { %3924 = vmatprep.subr.bf16.mxu1 %v4309_v48 }
 0x4d3   :  { %3926 = vmatpush3.bf16.msra.mxu1 %v4478_v3 }
 0x4d4   :  { %3945 = vmatprep.subr.bf16.mxu1 %v4309_v48 }
 0x591   :  { %v1133_v20 = vpop.f32.mrb[10].mxu1 }
 0x592   :  { %v1134_v21 = vadd.f32 %v1133_v20, %v1063_v19  ;;  %v3221_v22 = vpop.f32.mrb[11].mxu1 }
 0x594   :  { %4249 = vtanh.f32 %v1134_v21  ;;  %v1673_v21 = vsel %vm267_vm0, %v4524_v39, %v4539_v40  ;;  %v1752_v39 = vsel %vm267_vm0, %v4582_v61, %v4539_v40 }
 0x59e   :  { %v4250_v23 = vpop.eup %4249 }
 0x59f   :  { %3247 = vmatmul.mubr.msk.f32.vlgmr.msra.gmra.mrb[8].mxu0 %vm725_vm2, %v4250_v23  ;;  %v1145_v24 = vrot.slane %v4250_v23, %v4370_v52 }
 0x5a0   :  { %3929 = vmatpush3.bf16.msra.mxu0 %v4404_v49  ;;  %3300 = vmatprep.mubr.msk.f32.mxu0 %vm4310_vm1, %v4306_v0 }
 0x5a1   :  { %1146 = vrot.lane.b32.xlu0 %v1145_v24, %s4308_s17  ;;  %3930 = vmatprep.subr.bf16.mxu0 %v4309_v48 }
 0x5a4   :  { %3932 = vmatpush3.bf16.msra.mxu0 %v4420_v7 }
 0x5a5   :  { %3933 = vmatprep.subr.bf16.mxu0 %v4309_v48 }
 0x5a8   :  { %3935 = vmatpush3.bf16.msra.mxu0 %v4442_v16 }
 0x5a9   :  { %3936 = vmatprep.subr.bf16.mxu0 %v4309_v48 }
 0x5ac   :  { %3938 = vmatpush3.bf16.msra.mxu0 %v4454_v60 }
 0x5ad   :  { %3939 = vmatprep.subr.bf16.mxu0 %v4309_v48 }
 0x5b0   :  { %3941 = vmatpush3.bf16.msra.mxu0 %v4466_v63 }
 0x5b1   :  { %3942 = vmatprep.subr.bf16.mxu0 %v4309_v48 }
 0x5b4   :  { %3944 = vmatpush3.bf16.msra.mxu0 %v4478_v3 }
 0x5b5   :  { %3963 = vmatprep.subr.bf16.mxu0 %v4309_v48 }
 0x613   :  { %v1147_v25 = vpop.permute.xlu0 %1146 }
 0x614   :  { %1150 = vst.msk [vmem:[#allocation2] sm:$0x3] %vm1149_vm7, %v1147_v25 }
 0x672   :  { %v1223_v28 = vpop.f32.mrb[8].mxu0 }
 0x673   :  { %v1224_v29 = vadd.f32 %v1223_v28, %v1154_v27  ;;  %v3248_v31 = vpop.f32.mrb[9].mxu0 }
 0x675   :  { %4251 = vtanh.f32 %v1224_v29 }
 0x67f   :  { %v4252_v33 = vpop.eup %4251 }
 0x680   :  { %3274 = vmatmul.mubr.msk.f32.vlgmr.msra.gmra.mrb[12].mxu1 %vm725_vm2, %v4252_v33  ;;  %v1235_v34 = vrot.slane %v4252_v33, %v4370_v52  ;;  %v1842_v33 = vsel %vm267_vm0, %v4667_v38, %v4539_v40 }
 0x681   :  { %3947 = vmatpush3.bf16.msra.mxu1 %v4404_v49  ;;  %3327 = vmatprep.mubr.msk.f32.mxu1 %vm4310_vm1, %v4306_v0 }
 0x682   :  { %1236 = vrot.lane.b32.xlu1 %v1235_v34, %s4311_s3  ;;  %3948 = vmatprep.subr.bf16.mxu1 %v4309_v48 }
 0x685   :  { %3950 = vmatpush3.bf16.msra.mxu1 %v4420_v7 }
 0x686   :  { %3951 = vmatprep.subr.bf16.mxu1 %v4309_v48 }
 0x689   :  { %3953 = vmatpush3.bf16.msra.mxu1 %v4442_v16 }
 0x68a   :  { %3954 = vmatprep.subr.bf16.mxu1 %v4309_v48 }
 0x68d   :  { %3956 = vmatpush3.bf16.msra.mxu1 %v4454_v60 }
 0x68e   :  { %3957 = vmatprep.subr.bf16.mxu1 %v4309_v48 }
 0x691   :  { %3959 = vmatpush3.bf16.msra.mxu1 %v4466_v63 }
 0x692   :  { %3960 = vmatprep.subr.bf16.mxu1 %v4309_v48 }
 0x695   :  { %3962 = vmatpush3.bf16.msra.mxu1 %v4478_v3 }
 0x696   :  { %3981 = vmatprep.subr.bf16.mxu1 %v4309_v48 }
 0x6f4   :  { %v1237_v42 = vpop.permute.xlu1 %1236 }
 0x6f5   :  { %1239 = vst.msk [vmem:[#allocation2 + $0x2] sm:$0x3] %vm891_vm4, %v1237_v42 }
 0x753   :  { %v1312_v44 = vpop.f32.mrb[12].mxu1 }
 0x754   :  { %v1313_v45 = vadd.f32 %v1312_v44, %v1243_v43  ;;  %v3275_v46 = vpop.f32.mrb[13].mxu1  ;;  %v1931_v44 = vsel %vm267_vm0, %v4584_v62, %v4539_v40 }
 0x756   :  { %4253 = vtanh.f32 %v1313_v45 }
 0x760   :  { %v4254_v47 = vpop.eup %4253 }
 0x761   :  { %3301 = vmatmul.mubr.msk.f32.vlgmr.msra.gmra.mrb[10].mxu0 %vm725_vm2, %v4254_v47  ;;  %v1324_v50 = vrot.slane %v4254_v47, %v4370_v52 }
 0x762   :  { %3965 = vmatpush3.bf16.msra.mxu0 %v4404_v49  ;;  %3354 = vmatprep.mubr.msk.f32.mxu0 %vm4310_vm1, %v4306_v0 }
 0x763   :  { %1325 = vrot.lane.b32.xlu1 %v1324_v50, %s4312_s18  ;;  %3966 = vmatprep.subr.bf16.mxu0 %v4309_v48 }
 0x766   :  { %3968 = vmatpush3.bf16.msra.mxu0 %v4420_v7 }
 0x767   :  { %3969 = vmatprep.subr.bf16.mxu0 %v4309_v48 }
 0x76a   :  { %3971 = vmatpush3.bf16.msra.mxu0 %v4442_v16 }
 0x76b   :  { %3972 = vmatprep.subr.bf16.mxu0 %v4309_v48 }
 0x76e   :  { %3974 = vmatpush3.bf16.msra.mxu0 %v4454_v60 }
 0x76f   :  { %3975 = vmatprep.subr.bf16.mxu0 %v4309_v48 }
 0x772   :  { %3977 = vmatpush3.bf16.msra.mxu0 %v4466_v63 }
 0x773   :  { %3978 = vmatprep.subr.bf16.mxu0 %v4309_v48 }
 0x776   :  { %3980 = vmatpush3.bf16.msra.mxu0 %v4478_v3 }
 0x777   :  { %3999 = vmatprep.subr.bf16.mxu0 %v4309_v48 }
 0x7d5   :  { %v1326_v30 = vpop.permute.xlu1 %1325 }
 0x7d6   :  { %1328 = vst.msk [vmem:[#allocation2 + $0x2] sm:$0x3] %vm981_vm5, %v1326_v30 }
 0x834   :  { %v1398_v15 = vpop.f32.mrb[10].mxu0 }
 0x835   :  { %v1399_v53 = vadd.f32 %v1398_v15, %v1329_v51  ;;  %v3302_v54 = vpop.f32.mrb[11].mxu0  ;;  %v2017_v51 = vsel %vm267_vm0, %v4531_v37, %v4539_v40 }
 0x837   :  { %4255 = vtanh.f32 %v1399_v53 }
 0x841   :  { %v4256_v55 = vpop.eup %4255 }
 0x842   :  { %1403 = vst.msk [vmem:[#allocation2 + $0x2] sm:$0x3] %vm1057_vm6, %v4256_v55  ;;  %3328 = vmatmul.mubr.msk.f32.vlgmr.msra.gmra.mrb[14].mxu1 %vm725_vm2, %v4256_v55 }
 0x843   :  { %3983 = vmatpush3.bf16.msra.mxu1 %v4404_v49  ;;  %3381 = vmatprep.mubr.msk.f32.mxu1 %vm4310_vm1, %v4306_v0 }
 0x844   :  { %3984 = vmatprep.subr.bf16.mxu1 %v4309_v48 }
 0x847   :  { %3986 = vmatpush3.bf16.msra.mxu1 %v4420_v7 }
 0x848   :  { %3987 = vmatprep.subr.bf16.mxu1 %v4309_v48 }
 0x84b   :  { %3989 = vmatpush3.bf16.msra.mxu1 %v4442_v16 }
 0x84c   :  { %3990 = vmatprep.subr.bf16.mxu1 %v4309_v48 }
 0x84f   :  { %3992 = vmatpush3.bf16.msra.mxu1 %v4454_v60 }
 0x850   :  { %3993 = vmatprep.subr.bf16.mxu1 %v4309_v48 }
 0x853   :  { %3995 = vmatpush3.bf16.msra.mxu1 %v4466_v63 }
 0x854   :  { %3996 = vmatprep.subr.bf16.mxu1 %v4309_v48 }
 0x857   :  { %3998 = vmatpush3.bf16.msra.mxu1 %v4478_v3 }
 0x858   :  { %4017 = vmatprep.subr.bf16.mxu1 %v4309_v48 }
 0x915   :  { %v1478_v56 = vpop.f32.mrb[14].mxu1 }
 0x916   :  { %v1479_v57 = vadd.f32 %v1478_v56, %v1408_v32  ;;  %v3329_v58 = vpop.f32.mrb[15].mxu1  ;;  %v2356_v56 = vld [vmem:[%s5133_s5 + $0x8] sm:$0xff] }
 0x918   :  { %4257 = vtanh.f32 %v1479_v57  ;;  %v2373_v57 = vld [vmem:[%s5133_s5 + $0x90] sm:$0xff] }
 0x922   :  { %v4258_v1 = vpop.eup %4257 }
 0x923   :  { %3355 = vmatmul.mubr.msk.f32.vlgmr.msra.gmra.mrb[12].mxu0 %vm725_vm2, %v4258_v1  ;;  %v1490_v2 = vrot.slane %v4258_v1, %v4370_v52 }
 0x924   :  { %4001 = vmatpush3.bf16.msra.mxu0 %v4404_v49  ;;  %3408 = vmatprep.mubr.msk.f32.mxu0 %vm4310_vm1, %v4306_v0 }
 0x925   :  { %1491 = vrot.lane.b32.xlu1 %v1490_v2, %s4308_s17  ;;  %4002 = vmatprep.subr.bf16.mxu0 %v4309_v48  ;;  %v2357_v2 = vld [vmem:[%s5133_s5 + $0x10] sm:$0xff] }
 0x928   :  { %4004 = vmatpush3.bf16.msra.mxu0 %v4420_v7 }
 0x929   :  { %4005 = vmatprep.subr.bf16.mxu0 %v4309_v48 }
 0x92c   :  { %4007 = vmatpush3.bf16.msra.mxu0 %v4442_v16 }
 0x92d   :  { %4008 = vmatprep.subr.bf16.mxu0 %v4309_v48 }
 0x930   :  { %4010 = vmatpush3.bf16.msra.mxu0 %v4454_v60 }
 0x931   :  { %4011 = vmatprep.subr.bf16.mxu0 %v4309_v48 }
 0x934   :  { %4013 = vmatpush3.bf16.msra.mxu0 %v4466_v63 }
 0x935   :  { %4014 = vmatprep.subr.bf16.mxu0 %v4309_v48 }
 0x938   :  { %4016 = vmatpush3.bf16.msra.mxu0 %v4478_v3 }
 0x939   :  { %4035 = vmatprep.subr.bf16.mxu0 %v4309_v48 }
 0x997   :  { %v1492_v4 = vpop.permute.xlu1 %1491 }
 0x998   :  { %1494 = vst.msk [vmem:[#allocation2 + $0x2] sm:$0x3] %vm1149_vm7, %v1492_v4  ;;  %v2358_v4 = vld [vmem:[%s5133_s5 + $0x18] sm:$0xff] }
 0x9f6   :  { %v1567_v6 = vpop.f32.mrb[12].mxu0 }
 0x9f7   :  { %v1568_v8 = vadd.f32 %v1567_v6, %v1498_v5  ;;  %v3356_v9 = vpop.f32.mrb[13].mxu0  ;;  %v2375_v6 = vld [vmem:[%s5133_s5 + $0xa0] sm:$0xff] }
 0x9f9   :  { %4259 = vtanh.f32 %v1568_v8  ;;  %v2376_v8 = vld [vmem:[%s5133_s5 + $0xa8] sm:$0xff] }
 0xa03   :  { %v4260_v10 = vpop.eup %4259 }
 0xa04   :  { %3382 = vmatmul.mubr.msk.f32.vlgmr.msra.gmra.mrb[16].mxu1 %vm725_vm2, %v4260_v10  ;;  %v1579_v11 = vrot.slane %v4260_v10, %v4370_v52  ;;  %v4149_v10 = vpack.c.bf16 %v2358_v4, %v2357_v2 }
 0xa05   :  { %4019 = vmatpush3.bf16.msra.mxu1 %v4404_v49  ;;  %3435 = vmatprep.mubr.msk.f32.mxu1 %vm4310_vm1, %v4306_v0 }
 0xa06   :  { %1580 = vrot.lane.b32.xlu0 %v1579_v11, %s4311_s3  ;;  %4020 = vmatprep.subr.bf16.mxu1 %v4309_v48  ;;  %v4151_v11 = vpack.c.bf16 %v2376_v8, %v2375_v6  ;;  %v2408_v6 = vld [vmem:[%s5133_s5 + $0x1a8] sm:$0xff] }
 0xa09   :  { %4022 = vmatpush3.bf16.msra.mxu1 %v4420_v7 }
 0xa0a   :  { %4023 = vmatprep.subr.bf16.mxu1 %v4309_v48 }
 0xa0d   :  { %4025 = vmatpush3.bf16.msra.mxu1 %v4442_v16 }
 0xa0e   :  { %4026 = vmatprep.subr.bf16.mxu1 %v4309_v48 }
 0xa11   :  { %4028 = vmatpush3.bf16.msra.mxu1 %v4454_v60 }
 0xa12   :  { %4029 = vmatprep.subr.bf16.mxu1 %v4309_v48 }
 0xa15   :  { %4031 = vmatpush3.bf16.msra.mxu1 %v4466_v63 }
 0xa16   :  { %4032 = vmatprep.subr.bf16.mxu1 %v4309_v48 }
 0xa19   :  { %4034 = vmatpush3.bf16.msra.mxu1 %v4478_v3 }
 0xa1a   :  { %4053 = vmatprep.subr.bf16.mxu1 %v4309_v48 }
 0xa78   :  { %v1581_v59 = vpop.permute.xlu0 %1580 }
 0xa79   :  { %1583 = vst.msk [vmem:[#allocation2 + $0x4] sm:$0x3] %vm891_vm4, %v1581_v59  ;;  %v2359_v59 = vld [vmem:[%s5133_s5 + $0x20] sm:$0xff] }
 0xad7   :  { %v1656_v13 = vpop.f32.mrb[16].mxu1 }
 0xad8   :  { %v1657_v14 = vadd.f32 %v1656_v13, %v1587_v12  ;;  %v3383_v17 = vpop.f32.mrb[17].mxu1  ;;  %v2360_v12 = vld [vmem:[%s5133_s5 + $0x28] sm:$0xff]  ;;  %v2377_v13 = vld [vmem:[%s5133_s5 + $0xb0] sm:$0xff] }
 0xad9   :  { %v4153_v17 = vpack.c.bf16 %v2360_v12, %v2359_v59  ;;  %v2392_v59 = vld [vmem:[%s5133_s5 + $0x128] sm:$0xff]  ;;  %v2409_v12 = vld [vmem:[%s5133_s5 + $0x1b0] sm:$0xff] }
 0xada   :  { %4261 = vtanh.f32 %v1657_v14  ;;  %v2378_v14 = vld [vmem:[%s5133_s5 + $0xb8] sm:$0xff] }
 0xae4   :  { %v4262_v18 = vpop.eup %4261 }
 0xae5   :  { %3409 = vmatmul.mubr.msk.f32.vlgmr.msra.gmra.mrb[14].mxu0 %vm725_vm2, %v4262_v18  ;;  %v1668_v19 = vrot.slane %v4262_v18, %v4370_v52  ;;  %v4155_v18 = vpack.c.bf16 %v2378_v14, %v2377_v13  ;;  %v2410_v13 = vld [vmem:[%s5133_s5 + $0x1b8] sm:$0xff] }
 0xae6   :  { %4037 = vmatpush3.bf16.msra.mxu0 %v4404_v49  ;;  %3462 = vmatprep.mubr.msk.f32.mxu0 %vm4310_vm1, %v4306_v0 }
 0xae7   :  { %1669 = vrot.lane.b32.xlu0 %v1668_v19, %s4312_s18  ;;  %4038 = vmatprep.subr.bf16.mxu0 %v4309_v48  ;;  %v2361_v19 = vld [vmem:[%s5133_s5 + $0x30] sm:$0xff] }
 0xaea   :  { %4040 = vmatpush3.bf16.msra.mxu0 %v4420_v7 }
 0xaeb   :  { %4041 = vmatprep.subr.bf16.mxu0 %v4309_v48 }
 0xaee   :  { %4043 = vmatpush3.bf16.msra.mxu0 %v4442_v16 }
 0xaef   :  { %4044 = vmatprep.subr.bf16.mxu0 %v4309_v48 }
 0xaf2   :  { %4046 = vmatpush3.bf16.msra.mxu0 %v4454_v60 }
 0xaf3   :  { %4047 = vmatprep.subr.bf16.mxu0 %v4309_v48 }
 0xaf6   :  { %4049 = vmatpush3.bf16.msra.mxu0 %v4466_v63 }
 0xaf7   :  { %4050 = vmatprep.subr.bf16.mxu0 %v4309_v48 }
 0xafa   :  { %4052 = vmatpush3.bf16.msra.mxu0 %v4478_v3 }
 0xafb   :  { %4071 = vmatprep.subr.bf16.mxu0 %v4309_v48 }
 0xb59   :  { %v1670_v20 = vpop.permute.xlu0 %1669 }
 0xb5a   :  { %1672 = vst.msk [vmem:[#allocation2 + $0x4] sm:$0x3] %vm981_vm5, %v1670_v20  ;;  %v2362_v20 = vld [vmem:[%s5133_s5 + $0x38] sm:$0xff] }
 0xbb8   :  { %v1742_v22 = vpop.f32.mrb[14].mxu0 }
 0xbb9   :  { %v1743_v23 = vadd.f32 %v1742_v22, %v1673_v21  ;;  %v3410_v24 = vpop.f32.mrb[15].mxu0  ;;  %v2379_v21 = vld [vmem:[%s5133_s5 + $0xc0] sm:$0xff]  ;;  %v2380_v22 = vld [vmem:[%s5133_s5 + $0xc8] sm:$0xff] }
 0xbba   :  { %v4159_v24 = vpack.c.bf16 %v2380_v22, %v2379_v21  ;;  %v2412_v21 = vld [vmem:[%s5133_s5 + $0x1c8] sm:$0xff] }
 0xbbb   :  { %4263 = vtanh.f32 %v1743_v23  ;;  %v4157_v23 = vpack.c.bf16 %v2362_v20, %v2361_v19  ;;  %v2394_v19 = vld [vmem:[%s5133_s5 + $0x138] sm:$0xff]  ;;  %v2411_v20 = vld [vmem:[%s5133_s5 + $0x1c0] sm:$0xff] }
 0xbc5   :  { %v4264_v25 = vpop.eup %4263 }
 0xbc6   :  { %1747 = vst.msk [vmem:[#allocation2 + $0x4] sm:$0x3] %vm1057_vm6, %v4264_v25  ;;  %3436 = vmatmul.mubr.msk.f32.vlgmr.msra.gmra.mrb[18].mxu1 %vm725_vm2, %v4264_v25  ;;  %v2363_v25 = vld [vmem:[%s5133_s5 + $0x40] sm:$0xff] }
 0xbc7   :  { %4055 = vmatpush3.bf16.msra.mxu1 %v4404_v49  ;;  %3489 = vmatprep.mubr.msk.f32.mxu1 %vm4310_vm1, %v4306_v0 }
 0xbc8   :  { %4056 = vmatprep.subr.bf16.mxu1 %v4309_v48 }
 0xbcb   :  { %4058 = vmatpush3.bf16.msra.mxu1 %v4420_v7 }
 0xbcc   :  { %4059 = vmatprep.subr.bf16.mxu1 %v4309_v48 }
 0xbcf   :  { %4061 = vmatpush3.bf16.msra.mxu1 %v4442_v16 }
 0xbd0   :  { %4062 = vmatprep.subr.bf16.mxu1 %v4309_v48 }
 0xbd3   :  { %4064 = vmatpush3.bf16.msra.mxu1 %v4454_v60 }
 0xbd4   :  { %4065 = vmatprep.subr.bf16.mxu1 %v4309_v48 }
 0xbd7   :  { %4067 = vmatpush3.bf16.msra.mxu1 %v4466_v63 }
 0xbd8   :  { %4068 = vmatprep.subr.bf16.mxu1 %v4309_v48 }
 0xbdb   :  { %4070 = vmatpush3.bf16.msra.mxu1 %v4478_v3 }
 0xbdc   :  { %4089 = vmatprep.subr.bf16.mxu1 %v4309_v48 }
 0xc99   :  { %v1822_v26 = vpop.f32.mrb[18].mxu1 }
 0xc9a   :  { %v1823_v27 = vadd.f32 %v1822_v26, %v1752_v39  ;;  %v3437_v28 = vpop.f32.mrb[19].mxu1  ;;  %v2364_v39 = vld [vmem:[%s5133_s5 + $0x48] sm:$0xff]  ;;  %v2381_v26 = vld [vmem:[%s5133_s5 + $0xd0] sm:$0xff] }
 0xc9b   :  { %v4161_v28 = vpack.c.bf16 %v2364_v39, %v2363_v25  ;;  %v2396_v25 = vld [vmem:[%s5133_s5 + $0x148] sm:$0xff]  ;;  %v2413_v39 = vld [vmem:[%s5133_s5 + $0x1d0] sm:$0xff] }
 0xc9c   :  { %4265 = vtanh.f32 %v1823_v27  ;;  %v2382_v27 = vld [vmem:[%s5133_s5 + $0xd8] sm:$0xff] }
 0xca6   :  { %v4266_v29 = vpop.eup %4265 }
 0xca7   :  { %3463 = vmatmul.mubr.msk.f32.vlgmr.msra.gmra.mrb[16].mxu0 %vm725_vm2, %v4266_v29  ;;  %v1834_v31 = vrot.slane %v4266_v29, %v4370_v52  ;;  %v4163_v29 = vpack.c.bf16 %v2382_v27, %v2381_v26  ;;  %v2414_v26 = vld [vmem:[%s5133_s5 + $0x1d8] sm:$0xff] }
 0xca8   :  { %4073 = vmatpush3.bf16.msra.mxu0 %v4404_v49  ;;  %3516 = vmatprep.mubr.msk.f32.mxu0 %vm4310_vm1, %v4306_v0 }
 0xca9   :  { %1835 = vrot.lane.b32.xlu0 %v1834_v31, %s4308_s17  ;;  %4074 = vmatprep.subr.bf16.mxu0 %v4309_v48  ;;  %v2365_v31 = vld [vmem:[%s5133_s5 + $0x50] sm:$0xff] }
 0xcac   :  { %4076 = vmatpush3.bf16.msra.mxu0 %v4420_v7 }
 0xcad   :  { %4077 = vmatprep.subr.bf16.mxu0 %v4309_v48 }
 0xcb0   :  { %4079 = vmatpush3.bf16.msra.mxu0 %v4442_v16 }
 0xcb1   :  { %4080 = vmatprep.subr.bf16.mxu0 %v4309_v48 }
 0xcb4   :  { %4082 = vmatpush3.bf16.msra.mxu0 %v4454_v60 }
 0xcb5   :  { %4083 = vmatprep.subr.bf16.mxu0 %v4309_v48 }
 0xcb8   :  { %4085 = vmatpush3.bf16.msra.mxu0 %v4466_v63 }
 0xcb9   :  { %4086 = vmatprep.subr.bf16.mxu0 %v4309_v48 }
 0xcbc   :  { %4088 = vmatpush3.bf16.msra.mxu0 %v4478_v3 }
 0xcbd   :  { %4107 = vmatprep.subr.bf16.mxu0 %v4309_v48 }
 0xd1b   :  { %v1836_v61 = vpop.permute.xlu0 %1835 }
 0xd1c   :  { %1838 = vst.msk [vmem:[#allocation2 + $0x4] sm:$0x3] %vm1149_vm7, %v1836_v61  ;;  %v2366_v61 = vld [vmem:[%s5133_s5 + $0x58] sm:$0xff] }
 0xd7a   :  { %v1911_v34 = vpop.f32.mrb[16].mxu0 }
 0xd7b   :  { %v1912_v35 = vadd.f32 %v1911_v34, %v1842_v33  ;;  %v3464_v36 = vpop.f32.mrb[17].mxu0  ;;  %v2383_v33 = vld [vmem:[%s5133_s5 + $0xe0] sm:$0xff]  ;;  %v2384_v34 = vld [vmem:[%s5133_s5 + $0xe8] sm:$0xff] }
 0xd7c   :  { %v4167_v36 = vpack.c.bf16 %v2384_v34, %v2383_v33  ;;  %v2416_v33 = vld [vmem:[%s5133_s5 + $0x1e8] sm:$0xff] }
 0xd7d   :  { %4267 = vtanh.f32 %v1912_v35  ;;  %v4165_v35 = vpack.c.bf16 %v2366_v61, %v2365_v31  ;;  %v2398_v31 = vld [vmem:[%s5133_s5 + $0x158] sm:$0xff]  ;;  %v2415_v61 = vld [vmem:[%s5133_s5 + $0x1e0] sm:$0xff] }
 0xd87   :  { %v4268_v42 = vpop.eup %4267 }
 0xd88   :  { %3490 = vmatmul.mubr.msk.f32.vlgmr.msra.gmra.mrb[20].mxu1 %vm725_vm2, %v4268_v42  ;;  %v1923_v43 = vrot.slane %v4268_v42, %v4370_v52  ;;  %v2367_v42 = vld [vmem:[%s5133_s5 + $0x60] sm:$0xff] }
 0xd89   :  { %4091 = vmatpush3.bf16.msra.mxu1 %v4404_v49  ;;  %3543 = vmatprep.mubr.msk.f32.mxu1 %vm4310_vm1, %v4306_v0 }
 0xd8a   :  { %1924 = vrot.lane.b32.xlu1 %v1923_v43, %s4311_s3  ;;  %4092 = vmatprep.subr.bf16.mxu1 %v4309_v48  ;;  %v2368_v43 = vld [vmem:[%s5133_s5 + $0x68] sm:$0xff] }
 0xd8d   :  { %4094 = vmatpush3.bf16.msra.mxu1 %v4420_v7 }
 0xd8e   :  { %4095 = vmatprep.subr.bf16.mxu1 %v4309_v48 }
 0xd91   :  { %4097 = vmatpush3.bf16.msra.mxu1 %v4442_v16 }
 0xd92   :  { %4098 = vmatprep.subr.bf16.mxu1 %v4309_v48 }
 0xd95   :  { %4100 = vmatpush3.bf16.msra.mxu1 %v4454_v60 }
 0xd96   :  { %4101 = vmatprep.subr.bf16.mxu1 %v4309_v48 }
 0xd99   :  { %4103 = vmatpush3.bf16.msra.mxu1 %v4466_v63 }
 0xd9a   :  { %4104 = vmatprep.subr.bf16.mxu1 %v4309_v48 }
 0xd9d   :  { %4106 = vmatpush3.bf16.msra.mxu1 %v4478_v3 }
 0xd9e   :  { %4125 = vmatprep.subr.bf16.mxu1 %v4309_v48 }
 0xdfc   :  { %v1925_v38 = vpop.permute.xlu1 %1924 }
 0xdfd   :  { %1927 = vst.msk [vmem:[#allocation2 + $0x6] sm:$0x3] %vm891_vm4, %v1925_v38  ;;  %v2385_v38 = vld [vmem:[%s5133_s5 + $0xf0] sm:$0xff] }
 0xe5b   :  { %v2000_v45 = vpop.f32.mrb[20].mxu1 }
 0xe5c   :  { %v2001_v46 = vadd.f32 %v2000_v45, %v1931_v44  ;;  %v3491_v47 = vpop.f32.mrb[21].mxu1  ;;  %v2386_v44 = vld [vmem:[%s5133_s5 + $0xf8] sm:$0xff]  ;;  %v4169_v45 = vpack.c.bf16 %v2368_v43, %v2367_v42  ;;  %v2400_v42 = vld [vmem:[%s5133_s5 + $0x168] sm:$0xff]  ;;  %v2417_v43 = vld [vmem:[%s5133_s5 + $0x1f0] sm:$0xff] }
 0xe5d   :  { %v2369_v47 = vld [vmem:[%s5133_s5 + $0x70] sm:$0xff] }
 0xe5e   :  { %4269 = vtanh.f32 %v2001_v46  ;;  %v4171_v46 = vpack.c.bf16 %v2386_v44, %v2385_v38  ;;  %v2418_v38 = vld [vmem:[%s5133_s5 + $0x1f8] sm:$0xff] }
 0xe68   :  { %v4270_v50 = vpop.eup %4269 }
 0xe69   :  { %3517 = vmatmul.mubr.msk.f32.vlgmr.msra.gmra.mrb[18].mxu0 %vm725_vm2, %v4270_v50  ;;  %v2012_v30 = vrot.slane %v4270_v50, %v4370_v52  ;;  %v2370_v50 = vld [vmem:[%s5133_s5 + $0x78] sm:$0xff] }
 0xe6a   :  { %4109 = vmatpush3.bf16.msra.mxu0 %v4404_v49  ;;  %3570 = vmatprep.mubr.msk.f32.mxu0 %vm4310_vm1, %v4306_v0 }
 0xe6b   :  { %2013 = vrot.lane.b32.xlu1 %v2012_v30, %s4312_s18  ;;  %4110 = vmatprep.subr.bf16.mxu0 %v4309_v48  ;;  %v4173_v30 = vpack.c.bf16 %v2370_v50, %v2369_v47  ;;  %v2402_v47 = vld [vmem:[%s5133_s5 + $0x178] sm:$0xff] }
 0xe6e   :  { %4112 = vmatpush3.bf16.msra.mxu0 %v4420_v7 }
 0xe6f   :  { %4113 = vmatprep.subr.bf16.mxu0 %v4309_v48 }
 0xe72   :  { %4115 = vmatpush3.bf16.msra.mxu0 %v4442_v16 }
 0xe73   :  { %4116 = vmatprep.subr.bf16.mxu0 %v4309_v48 }
 0xe76   :  { %4118 = vmatpush3.bf16.msra.mxu0 %v4454_v60 }
 0xe77   :  { %4119 = vmatprep.subr.bf16.mxu0 %v4309_v48 }
 0xe7a   :  { %4121 = vmatpush3.bf16.msra.mxu0 %v4466_v63 }
 0xe7b   :  { %4122 = vmatprep.subr.bf16.mxu0 %v4309_v48 }
 0xe7e   :  { %4124 = vmatpush3.bf16.msra.mxu0 %v4478_v3 }
 0xedd   :  { %v2014_v62 = vpop.permute.xlu1 %2013 }
 0xede   :  { %2016 = vst.msk [vmem:[#allocation2 + $0x6] sm:$0x3] %vm981_vm5, %v2014_v62  ;;  %v2403_v62 = vld [vmem:[%s5133_s5 + $0x180] sm:$0xff] }
 0xf3c   :  { %v2086_v15 = vpop.f32.mrb[18].mxu0 }
 0xf3d   :  { %v2087_v53 = vadd.f32 %v2086_v15, %v2017_v51  ;;  %v3518_v54 = vpop.f32.mrb[19].mxu0  ;;  %v2404_v51 = vld [vmem:[%s5133_s5 + $0x188] sm:$0xff] }
 0xf3e   :  { %v4175_v15 = vpack.c.bf16 %v2404_v51, %v2403_v62 }
 0xf3f   :  { %4271 = vtanh.f32 %v2087_v53 }
 0xf49   :  { %v4272_v55 = vpop.eup %4271 }
 0xf4a   :  { %2091 = vst.msk [vmem:[#allocation2 + $0x6] sm:$0x3] %vm1057_vm6, %v4272_v55  ;;  %3544 = vmatmul.mubr.msk.f32.vlgmr.msra.gmra.mrb[22].mxu1 %vm725_vm2, %v4272_v55 }
 0xf4b   :  { %4127 = vmatpush3.bf16.msra.mxu1 %v4404_v49  ;;  %3597 = vmatprep.mubr.msk.f32.mxu1 %vm4310_vm1, %v4306_v0  ;;  %v2371_v49 = vld [vmem:[%s5133_s5 + $0x80] sm:$0xff] }
 0xf4c   :  { %4128 = vmatprep.subr.bf16.mxu1 %v4309_v48 }
 0xf4f   :  { %4130 = vmatpush3.bf16.msra.mxu1 %v4420_v7  ;;  %v2372_v7 = vld [vmem:[%s5133_s5 + $0x88] sm:$0xff] }
 0xf50   :  { %4131 = vmatprep.subr.bf16.mxu1 %v4309_v48 }
 0xf53   :  { %4133 = vmatpush3.bf16.msra.mxu1 %v4442_v16  ;;  %v4143_v16 = vpack.c.bf16 %v2372_v7, %v2371_v49  ;;  %v4988_v7 = vsel %vm267_vm0, 0.0, %v4539_v40 }
 0xf54   :  { %4134 = vmatprep.subr.bf16.mxu1 %v4309_v48 }
 0xf55   :  { %4144 = vmatprep.subr.bf16.mxu0 %v4143_v16 }
 0xf57   :  { %4136 = vmatpush3.bf16.msra.mxu1 %v4454_v60  ;;  %v2096_v60 = vsel %vm267_vm0, %v4669_v41, %v4539_v40  ;;  %v2374_v41 = vld [vmem:[%s5133_s5 + $0x98] sm:$0xff]  ;;  %v2405_v40 = vld [vmem:[%s5133_s5 + $0x190] sm:$0xff] }
 0xf58   :  { %4137 = vmatprep.subr.bf16.mxu1 %v4309_v48  ;;  %v4147_v1 = vpack.c.bf16 %v2374_v41, %v2373_v57 }
 0xf5b   :  { %4139 = vmatpush3.bf16.msra.mxu1 %v4466_v63 }
 0xf5c   :  { %4140 = vmatprep.subr.bf16.mxu1 %v4309_v48 }
 0xf5f   :  { %4142 = vmatpush3.bf16.msra.mxu1 %v4478_v3  ;;  %v2355_v3 = vld [vmem:[%s5133_s5] sm:$0xff] }
 0xf60   :  { %v4145_v58 = vpack.c.bf16 %v2356_v56, %v2355_v3  ;;  %4176 = vmatprep.subr.bf16.mxu1 %v4175_v15  ;;  %v2388_v3 = vld [vmem:[%s5133_s5 + $0x108] sm:$0xff]  ;;  %v2406_v56 = vld [vmem:[%s5133_s5 + $0x198] sm:$0xff]  ;;  %v2419_v15 = vld [vmem:[%s5133_s5 + $0x200] sm:$0xff] }
 0xf61   :  { %v4179_v41 = vpack.c.bf16 %v2406_v56, %v2405_v40  ;;  %v2425_v56 = vld [vmem:[%s5133_s5 + $0x230] sm:$0xff] }
0x101d   :  { %v2166_v37 = vpop.f32.mrb[22].mxu1 }
0x101e   :  { %v2167_v63 = vadd.f32 %v2166_v37, %v2096_v60  ;;  %v3545_v32 = vpop.f32.mrb[23].mxu1 }
0x101f   :  { %v2387_v32 = vld [vmem:[%s5133_s5 + $0x100] sm:$0xff] }
0x1020   :  { %4273 = vtanh.f32 %v2167_v63  ;;  %v4177_v57 = vpack.c.bf16 %v2388_v3, %v2387_v32  ;;  %v2423_v3 = vld [vmem:[%s5133_s5 + $0x220] sm:$0xff] }
0x102a   :  { %v4274_v5 = vpop.eup %4273 }
0x102b   :  { %3571 = vmatmul.mubr.msk.f32.vlgmr.msra.gmra.mrb[20].mxu0 %vm725_vm2, %v4274_v5  ;;  %v2178_v9 = vrot.slane %v4274_v5, %v4370_v52  ;;  %v2407_v5 = vld [vmem:[%s5133_s5 + $0x1a0] sm:$0xff] }
0x102c   :  { %4146 = vmatpush3.bf16.msra.mxu0 %v4145_v58  ;;  %v2389_v58 = vld [vmem:[%s5133_s5 + $0x110] sm:$0xff] }
0x102d   :  { %2179 = vrot.lane.b32.xlu1 %v2178_v9, %s4308_s17  ;;  %4148 = vmatprep.subr.bf16.mxu0 %v4147_v1  ;;  %v2390_v1 = vld [vmem:[%s5133_s5 + $0x118] sm:$0xff] }
0x102e   :  { %v4181_v9 = vpack.c.bf16 %v2390_v1, %v2389_v58  ;;  %v2707_v1 = vld [vmem:[%s5134_s6] ss:$0 sm:$0xff] }
0x1030   :  { %4150 = vmatpush3.bf16.msra.mxu0 %v4149_v10  ;;  %v4183_v10 = vpack.c.bf16 %v2408_v6, %v2407_v5 }
0x1031   :  { %4152 = vmatprep.subr.bf16.mxu0 %v4151_v11  ;;  %v2391_v11 = vld [vmem:[%s5133_s5 + $0x120] sm:$0xff] }
0x1032   :  { %v4185_v14 = vpack.c.bf16 %v2392_v59, %v2391_v11 }
0x1034   :  { %4154 = vmatpush3.bf16.msra.mxu0 %v4153_v17  ;;  %v4187_v17 = vpack.c.bf16 %v2410_v13, %v2409_v12 }
0x1035   :  { %4156 = vmatprep.subr.bf16.mxu0 %v4155_v18  ;;  %v2393_v18 = vld [vmem:[%s5133_s5 + $0x130] sm:$0xff] }
0x1036   :  { %v4189_v22 = vpack.c.bf16 %v2394_v19, %v2393_v18 }
0x1038   :  { %4158 = vmatpush3.bf16.msra.mxu0 %v4157_v23  ;;  %v4191_v23 = vpack.c.bf16 %v2412_v21, %v2411_v20 }
0x1039   :  { %4160 = vmatprep.subr.bf16.mxu0 %v4159_v24  ;;  %v2395_v24 = vld [vmem:[%s5133_s5 + $0x140] sm:$0xff] }
0x103a   :  { %v4193_v27 = vpack.c.bf16 %v2396_v25, %v2395_v24 }
0x103c   :  { %4162 = vmatpush3.bf16.msra.mxu0 %v4161_v28  ;;  %v4195_v28 = vpack.c.bf16 %v2414_v26, %v2413_v39 }
0x103d   :  { %4164 = vmatprep.subr.bf16.mxu0 %v4163_v29  ;;  %v2397_v29 = vld [vmem:[%s5133_s5 + $0x150] sm:$0xff] }
0x103e   :  { %v4197_v34 = vpack.c.bf16 %v2398_v31, %v2397_v29 }
0x1040   :  { %4166 = vmatpush3.bf16.msra.mxu0 %v4165_v35  ;;  %v4199_v35 = vpack.c.bf16 %v2416_v33, %v2415_v61 }
0x1041   :  { %4168 = vmatprep.subr.bf16.mxu0 %v4167_v36  ;;  %v2399_v36 = vld [vmem:[%s5133_s5 + $0x160] sm:$0xff] }
0x1042   :  { %v4201_v44 = vpack.c.bf16 %v2400_v42, %v2399_v36 }
0x1044   :  { %4170 = vmatpush3.bf16.msra.mxu0 %v4169_v45  ;;  %v4203_v45 = vpack.c.bf16 %v2418_v38, %v2417_v43 }
0x1045   :  { %4172 = vmatprep.subr.bf16.mxu0 %v4171_v46  ;;  %v2401_v46 = vld [vmem:[%s5133_s5 + $0x170] sm:$0xff] }
0x1046   :  { %v4205_v50 = vpack.c.bf16 %v2402_v47, %v2401_v46 }
0x1048   :  { %4174 = vmatpush3.bf16.msra.mxu0 %v4173_v30 }
0x1049   :  { %4207 = vmatprep.subr.bf16.mxu0 %v4309_v48 }
0x109f   :  { %v2180_v53 = vpop.permute.xlu1 %2179 }
0x10a0   :  { %2182 = vst.msk [vmem:[#allocation2 + $0x6] sm:$0x3] %vm1149_vm7, %v2180_v53  ;;  %v2420_v53 = vld [vmem:[%s5133_s5 + $0x208] sm:$0xff] }
0x10a7   :  { %v2353_v54 = vld [vmem:[#allocation2] sm:$0xff] }
0x10a8   :  { %v2443_v55 = vrot.slane %v2353_v54, %v4370_v52  ;;  %v2436_v63 = vcombine.high %v2353_v54, %v2353_v54  ;;  %v2421_v54 = vld [vmem:[%s5133_s5 + $0x210] sm:$0xff] }
0x10aa   :  { %v2451_v49 = vcombine.high %v2443_v55, %v2443_v55 }
0x10ac   :  { %2531 = vmatprep.mubr.f32.mxu0 %v2451_v49  ;;  %v4208_v49 = vpack.c.bf16 %v2420_v53, %v2419_v15 }
0x10ad   :  { %2532 = vmatmul.mubr.f32.vlgmr.msra.gmra.mrb[22].mxu0 %v2443_v55 }
0x10ae   :  { %3616 = vmatprep.mubr.msk.f32.mxu0 %vm4310_vm1, %v4306_v0  ;;  %v4998_v0 = vrot.slane %v2436_v63, %v4370_v52  ;;  %4209 = vmatpush3.bf16.msra.mxu0 %v4208_v49 }
0x10af   :  { %4210 = vmatprep.subr.bf16.mxu0 %v4309_v48 }
0x10b0   :  { %v2452_v4 = vcombine.high %v4998_v0, %v4998_v0 }
0x10fe   :  { %v2251_v16 = vpop.f32.mrb[20].mxu0 }
0x10ff   :  { %v2252_v60 = vadd.f32 %v2251_v16, %v4988_v7  ;;  %v3572_v37 = vpop.f32.mrb[21].mxu0  ;;  %v2422_v16 = vld [vmem:[%s5133_s5 + $0x218] sm:$0xff] }
0x1101   :  { %4275 = vtanh.f32 %v2252_v60  ;;  %v4211_v60 = vpack.c.bf16 %v2422_v16, %v2421_v54 }
0x1103   :  { %4212 = vmatpush3.bf16.msra.mxu0 %v4211_v60 }
0x1104   :  { %4213 = vmatprep.subr.bf16.mxu0 %v4309_v48 }
0x110b   :  { %v4276_v2 = vpop.eup %4275 }
0x110c   :  { %3598 = vmatmul.mubr.msk.f32.vlgmr.msra.gmra.mrb[24].mxu1 %vm725_vm2, %v4276_v2  ;;  %v2263_v8 = vrot.slane %v4276_v2, %v4370_v52 }
0x110d   :  { %4178 = vmatpush3.bf16.msra.mxu1 %v4177_v57  ;;  %2601 = vmatprep.mubr.f32.mxu1 %v2452_v4  ;;  %v2426_v57 = vld [vmem:[%s5133_s5 + $0x238] sm:$0xff] }
0x110e   :  { %2264 = vrot.lane.b32.xlu0 %v2263_v8, %s4311_s3  ;;  %4180 = vmatprep.subr.bf16.mxu1 %v4179_v41 }
0x1111   :  { %4182 = vmatpush3.bf16.msra.mxu1 %v4181_v9 }
0x1112   :  { %4184 = vmatprep.subr.bf16.mxu1 %v4183_v10 }
0x1115   :  { %4186 = vmatpush3.bf16.msra.mxu1 %v4185_v14 }
0x1116   :  { %4188 = vmatprep.subr.bf16.mxu1 %v4187_v17 }
0x1119   :  { %4190 = vmatpush3.bf16.msra.mxu1 %v4189_v22 }
0x111a   :  { %4192 = vmatprep.subr.bf16.mxu1 %v4191_v23 }
0x111d   :  { %4194 = vmatpush3.bf16.msra.mxu1 %v4193_v27 }
0x111e   :  { %4196 = vmatprep.subr.bf16.mxu1 %v4195_v28 }
0x1121   :  { %4198 = vmatpush3.bf16.msra.mxu1 %v4197_v34 }
0x1122   :  { %4200 = vmatprep.subr.bf16.mxu1 %v4199_v35 }
0x1125   :  { %4202 = vmatpush3.bf16.msra.mxu1 %v4201_v44 }
0x1126   :  { %4204 = vmatprep.subr.bf16.mxu1 %v4203_v45 }
0x1129   :  { %4206 = vmatpush3.bf16.msra.mxu1 %v4205_v50 }
0x112c   :  { %2602 = vmatmul.mubr.f32.vlgmr.msra.gmra.mrb[26].mxu1 %v4998_v0  ;;  %v2424_v0 = vld [vmem:[%s5133_s5 + $0x228] sm:$0xff] }
0x112d   :  { %v4214_v40 = vpack.c.bf16 %v2424_v0, %v2423_v3 }
0x112f   :  { %4215 = vmatpush3.bf16.msra.mxu0 %v4214_v40 }
0x1130   :  { %4216 = vmatprep.subr.bf16.mxu0 %v4309_v48 }
0x1180   :  { %v2265_v30 = vpop.permute.xlu0 %2264  ;;  %v3029_v62 = vpop.f32.mrb[22].mxu0 }
0x1181   :  { %2267 = vst.msk [vmem:[#allocation2 + $0x8] sm:$0x3] %vm891_vm4, %v2265_v30  ;;  %v3030_v51 = vpop.f32.mrb[23].mxu0 }
0x1182   :  { %v3031_v55 = vadd.f32 %v3030_v51, %v3029_v62 }
0x1184   :  { %v2534_v5 = vadd.f32 %v3031_v55, %v2707_v1 }
0x11df   :  { %v2336_v37 = vpop.f32.mrb[24].mxu1 }
0x11e0   :  { %v2337_v63 = vadd.f32 %v2336_v37, %v4988_v7  ;;  %v3599_v32 = vpop.f32.mrb[25].mxu1  ;;  %v4217_v7 = vpack.c.bf16 %v2426_v57, %v2425_v56 }
0x11e2   :  { %4277 = vtanh.f32 %v2337_v63  ;;  %4218 = vmatpush3.bf16.msra.mxu0 %v4217_v7 }
0x11ec   :  { %v4278_v41 = vpop.eup %4277 }
0x11ed   :  { %v2348_v58 = vrot.slane %v4278_v41, %v4370_v52 }
0x11ef   :  { %2349 = vrot.lane.b32.xlu1 %v2348_v58, %s4312_s18 }
0x11ff   :  { %v3064_v2 = vpop.f32.mrb[26].mxu1 }
0x1200   :  { %v3065_v4 = vpop.f32.mrb[27].mxu1 }
0x1201   :  { %v3066_v6 = vadd.f32 %v3065_v4, %v3064_v2 }
0x1203   :  { %v2604_v8 = vadd.f32 %v3066_v6, %v2534_v5 }
0x1261   :  { %v2350_v9 = vpop.permute.xlu1 %2349 }
0x1262   :  { %2352 = vst.msk [vmem:[#allocation2 + $0x8] sm:$0x3] %vm981_vm5, %v2350_v9 }
0x1269   :  { %v2708_v48 = vld.sshfl [vmem:[#allocation2 + $0x8] sm:$0x3 pattern:$0x76325410] }
0x126a   :  { %3617 = vmatmul.mubr.msk.f32.vlgmr.msra.gmra.mrb[24].mxu0 %vm2464_vm8, %v2708_v48 }
0x133d   :  { %v2673_v10 = vpop.f32.mrb[24].mxu0 }
0x133e   :  { %v2674_v52 = vadd.f32 %v2673_v10, %v2604_v8  ;;  %v3618_v11 = vpop.f32.mrb[25].mxu0 }
0x1340   :  { %2678 = vst.msk [vmem:[%s5135_s7] sm:$0x3] %vm2677_vm9, %v2674_v52 }
0x1341   :  { %2683 = vsyncpa [#allocation4], 1 }

</bundles_post_ra>
